<compile_context>
chip_gen: v5e
topology: v5e:2x2
jax: 0.10.0
libtpu: 0.0.40
codegen_flags: <defaults>
</compile_context>

<pallas_src>
import jax
import jax.numpy as jnp
from jax.experimental import pallas as pl
from jax.experimental.pallas import tpu as pltpu

Z_DIM = 64
W_DIM = 64
NUM_LAYERS = 8
LAYER_FEATURES = 256
EPS = 1e-8

PAD_OUT = 128              # w_dim (64) padded to a full lane width for dense stores
N_HIDDEN = NUM_LAYERS - 2  # 6 hidden 256->256 layers


def _round_up(x, m):
    return ((x + m - 1) // m) * m


def _cdiv(a, b):
    return -(-a // b)


def _choose_tm(B):
    """Batch tile: large enough to amortize per-grid-step overhead, but keep
    >= 2 grid steps for big batches so v7x's two TensorCores both get work."""
    B16 = _round_up(max(B, 1), 16)          # bf16 sublane packing: multiple of 16
    if B16 <= 512:
        return B16                          # small batch: single tile, no waste
    n_steps = max(2, _cdiv(B16, 1024))      # cap tile at 1024 rows, >= 2 steps
    return min(1024, _round_up(_cdiv(B16, n_steps), 16))


def mapping_kernel(z_ref, w0_ref, b0_ref, wh_ref, bh_ref, wl_ref, bl_ref, out_ref):
    """One batch tile: normalize_2nd_moment + 8 x (Linear + ReLU).

    z_ref:  (TM, 64)   f32
    w0_ref: (64, 256)  bf16                                  b0_ref: (1, 256) f32
    wh_ref: (6, 256, 256) bf16                               bh_ref: (6, 1, 256) f32
    wl_ref: (256, 128) bf16  (cols >= W_DIM are zero)        bl_ref: (1, 128) f32
    out_ref: (TM, 128) bf16  (cols >= W_DIM end up zero)
    """
    # normalize_2nd_moment over the true Z_DIM features (f32 math on VPU/EUP).
    x = z_ref[...]
    x = x * jax.lax.rsqrt(jnp.mean(x * x, axis=1, keepdims=True) + EPS)

    # Carry activations between layers in bf16; accumulate / bias / ReLU in f32.
    x = x.astype(jnp.bfloat16)

    # Layer 0: 64 -> 256
    acc = jnp.dot(x, w0_ref[...], preferred_element_type=jnp.float32) + b0_ref[...]
    x = jnp.maximum(acc, 0.0).astype(jnp.bfloat16)

    # Hidden layers 1..6: 256 -> 256, stacked weights, fully unrolled.
    for j in range(N_HIDDEN):
        acc = jnp.dot(x, wh_ref[j], preferred_element_type=jnp.float32) + bh_ref[j]
        x = jnp.maximum(acc, 0.0).astype(jnp.bfloat16)

    # Last layer: 256 -> (padded) 128; lane-dense bf16 store.
    acc = jnp.dot(x, wl_ref[...], preferred_element_type=jnp.float32) + bl_ref[...]
    out_ref[...] = jnp.maximum(acc, 0.0).astype(out_ref.dtype)


def init_params(key):
    """Deterministic nn.Linear-style init (uniform +-1/sqrt(fan_in)), f32."""
    features = [Z_DIM] + [LAYER_FEATURES] * (NUM_LAYERS - 1) + [W_DIM]
    weights, biases = [], []
    for i in range(NUM_LAYERS):
        key, kw, kb = jax.random.split(key, 3)
        fan_in, fan_out = features[i], features[i + 1]
        bound = 1.0 / (fan_in ** 0.5)
        # stored pre-transposed: (in_f, out_f)  (== torch weight (out,in).T)
        w = jax.random.uniform(kw, (fan_in, fan_out), jnp.float32, -bound, bound)
        b = jax.random.uniform(kb, (fan_out,), jnp.float32, -bound, bound)
        weights.append(w)
        biases.append(b)
    return weights, biases


def mapping_network(z, weights, biases):
    """Pallas wrapper: grid over batch tiles; parameters VMEM-resident."""
    B = z.shape[0]
    TM = _choose_tm(B)
    B_pad = _round_up(B, TM)
    grid = (B_pad // TM,)

    # --- pack parameters (once per call, plain JAX) ---
    z_p = z.astype(jnp.float32)
    if B_pad != B:
        z_p = jnp.pad(z_p, ((0, B_pad - B), (0, 0)))   # pad rows only; no lane pad

    # Layer 0: keep true (64, 256) shape, cast to bf16.
    w0 = weights[0].astype(jnp.bfloat16)
    b0 = biases[0].reshape(1, LAYER_FEATURES).astype(jnp.float32)

    # Hidden layers 1..6: stack into single arrays.
    wh = jnp.stack(weights[1:NUM_LAYERS - 1]).astype(jnp.bfloat16)           # (6,256,256)
    bh = jnp.stack([b.reshape(1, LAYER_FEATURES)
                    for b in biases[1:NUM_LAYERS - 1]]).astype(jnp.float32)  # (6,1,256)

    # Last layer: pad output cols 64 -> 128 for a lane-dense store.
    wl = (jnp.zeros((LAYER_FEATURES, PAD_OUT), jnp.float32)
          .at[:, :W_DIM].set(weights[-1])).astype(jnp.bfloat16)
    bl = jnp.zeros((1, PAD_OUT), jnp.float32).at[:, :W_DIM].set(biases[-1])

    # Parameter BlockSpecs: block == full array, index_map pinned to block 0,
    # so they are loaded once and stay resident in VMEM across grid steps.
    def resident(shape):
        n = len(shape)
        return pl.BlockSpec(shape, lambda i, _n=n: (0,) * _n)

    # Advisory cost estimate for XLA's scheduler around the custom call.
    param_bytes = (2 * (Z_DIM * LAYER_FEATURES
                        + N_HIDDEN * LAYER_FEATURES * LAYER_FEATURES
                        + LAYER_FEATURES * PAD_OUT)
                   + 4 * ((1 + N_HIDDEN) * LAYER_FEATURES + PAD_OUT))
    cost = pl.CostEstimate(
        flops=2 * B_pad * (Z_DIM * LAYER_FEATURES
                           + N_HIDDEN * LAYER_FEATURES * LAYER_FEATURES
                           + LAYER_FEATURES * PAD_OUT),
        transcendentals=B_pad,  # one rsqrt per row
        bytes_accessed=B_pad * Z_DIM * 4 + B_pad * PAD_OUT * 2 + param_bytes,
    )

    out = pl.pallas_call(
        mapping_kernel,
        out_shape=jax.ShapeDtypeStruct((B_pad, PAD_OUT), jnp.bfloat16),
        grid=grid,
        in_specs=[
            pl.BlockSpec((TM, Z_DIM), lambda i: (i, 0)),           # z tile (unpadded lanes)
            resident((Z_DIM, LAYER_FEATURES)),                     # w0
            resident((1, LAYER_FEATURES)),                         # b0
            resident((N_HIDDEN, LAYER_FEATURES, LAYER_FEATURES)),  # wh
            resident((N_HIDDEN, 1, LAYER_FEATURES)),               # bh
            resident((LAYER_FEATURES, PAD_OUT)),                   # wl
            resident((1, PAD_OUT)),                                # bl
        ],
        out_specs=pl.BlockSpec((TM, PAD_OUT), lambda i: (i, 0)),
        compiler_params=pltpu.CompilerParams(
            dimension_semantics=("parallel",)),                    # 2 TCs on v7x
        cost_estimate=cost,
    )(z_p, w0, b0, wh, bh, wl, bl)

    # Slice off row padding / lane padding and restore the module's f32 output.
    return out[:B, :W_DIM].astype(jnp.float32)


def mapping_network_ref(z, weights, biases):
    """Pure-JAX reference mirroring the PyTorch forward (bf16-weight matmuls,
    f32 accumulation) so it is numerically comparable to the kernel."""
    x = z.astype(jnp.float32)
    x = x * jax.lax.rsqrt(jnp.mean(x * x, axis=1, keepdims=True) + EPS)
    for w, b in zip(weights, biases):
        x = jnp.dot(x.astype(jnp.bfloat16), w.astype(jnp.bfloat16),
                    preferred_element_type=jnp.float32) + b
        x = jnp.maximum(x, 0.0)
    return x


if __name__ == "__main__":
    key = jax.random.PRNGKey(0)
    kz, kp = jax.random.split(key)

    batch = 8
    z = jax.random.normal(kz, (batch, Z_DIM), dtype=jnp.float32)
    weights, biases = init_params(kp)

    out = mapping_network(z, weights, biases)
    out = jax.block_until_ready(out)

    ref = mapping_network_ref(z, weights, biases)
    assert out.shape == (batch, W_DIM), out.shape
    assert jnp.allclose(out, ref, atol=2e-2, rtol=2e-2), (
        "mismatch vs reference: max abs diff = %g" % float(jnp.max(jnp.abs(out - ref))))

    print("KERNEL_OK")
</pallas_src>

<mosaic_0001>
module attributes {stable_mosaic.version = 11 : i64} {
  func.func @mapping_kernel(%arg0: i32, %arg1: memref<16x64xf32, #tpu.memory_space<vmem>>, %arg2: memref<64x256xbf16, #tpu.memory_space<vmem>>, %arg3: memref<1x256xf32, #tpu.memory_space<vmem>>, %arg4: memref<6x256x256xbf16, #tpu.memory_space<vmem>>, %arg5: memref<6x1x256xf32, #tpu.memory_space<vmem>>, %arg6: memref<256x128xbf16, #tpu.memory_space<vmem>>, %arg7: memref<1x128xf32, #tpu.memory_space<vmem>>, %arg8: memref<16x128xbf16, #tpu.memory_space<vmem>>) attributes {dimension_semantics = [#tpu.dimension_semantics<parallel>], iteration_bounds = array<i64: 1>, scalar_prefetch = 0 : i64, scratch_operands = 0 : i64, tpu.core_type = #tpu.core_type<tc>, window_params = [{transform_indices = @transform_0, window_bounds = array<i64: 16, 64>}, {pipeline_mode = #tpu.pipeline_mode<synchronous>, transform_indices = @transform_1, window_bounds = array<i64: 64, 256>}, {pipeline_mode = #tpu.pipeline_mode<synchronous>, transform_indices = @transform_2, window_bounds = array<i64: 1, 256>}, {pipeline_mode = #tpu.pipeline_mode<synchronous>, transform_indices = @transform_3, window_bounds = array<i64: 6, 256, 256>}, {pipeline_mode = #tpu.pipeline_mode<synchronous>, transform_indices = @transform_4, window_bounds = array<i64: 6, 1, 256>}, {pipeline_mode = #tpu.pipeline_mode<synchronous>, transform_indices = @transform_5, window_bounds = array<i64: 256, 128>}, {pipeline_mode = #tpu.pipeline_mode<synchronous>, transform_indices = @transform_6, window_bounds = array<i64: 1, 128>}, {transform_indices = @transform_7, window_bounds = array<i64: 16, 128>}]} {
    %c0 = arith.constant 0 : index
    %c0_0 = arith.constant 0 : index
    %0 = vector.load %arg1[%c0, %c0_0] : memref<16x64xf32, #tpu.memory_space<vmem>>, vector<16x64xf32>
    %1 = arith.mulf %0, %0 : vector<16x64xf32>
    %cst = arith.constant dense<0.000000e+00> : vector<16xf32>
    %2 = vector.multi_reduction <add>, %1, %cst [1] : vector<16x64xf32> to vector<16xf32>
    %3 = vector.shape_cast %2 : vector<16xf32> to vector<16x1xf32>
    %cst_1 = arith.constant 6.400000e+01 : f32
    %4 = vector.broadcast %cst_1 : f32 to vector<16x1xf32>
    %5 = arith.divf %3, %4 : vector<16x1xf32>
    %cst_2 = arith.constant 9.99999993E-9 : f32
    %6 = vector.broadcast %cst_2 : f32 to vector<16x1xf32>
    %7 = arith.addf %5, %6 : vector<16x1xf32>
    %8 = math.rsqrt %7 : vector<16x1xf32>
    %9 = vector.broadcast %8 : vector<16x1xf32> to vector<16x64xf32>
    %10 = arith.mulf %0, %9 : vector<16x64xf32>
    %11 = arith.truncf %10 : vector<16x64xf32> to vector<16x64xbf16>
    %c0_3 = arith.constant 0 : index
    %c0_4 = arith.constant 0 : index
    %12 = vector.load %arg2[%c0_3, %c0_4] : memref<64x256xbf16, #tpu.memory_space<vmem>>, vector<64x256xbf16>
    %cst_5 = arith.constant dense<0.000000e+00> : vector<16x256xf32>
    %13 = tpu.matmul %11, %12, %cst_5 {dimension_numbers = #tpu.dot_dimension_numbers<[1], [0], [0], [1], [0, 0, 1, 1], [], []>} : vector<16x64xbf16>, vector<64x256xbf16>, vector<16x256xf32> -> vector<16x256xf32>
    %c0_6 = arith.constant 0 : index
    %c0_7 = arith.constant 0 : index
    %14 = vector.load %arg3[%c0_6, %c0_7] : memref<1x256xf32, #tpu.memory_space<vmem>>, vector<1x256xf32>
    %15 = vector.broadcast %14 : vector<1x256xf32> to vector<16x256xf32>
    %16 = arith.addf %13, %15 : vector<16x256xf32>
    %cst_8 = arith.constant 0.000000e+00 : f32
    %17 = vector.broadcast %cst_8 : f32 to vector<16x256xf32>
    %18 = arith.maximumf %16, %17 : vector<16x256xf32>
    %19 = arith.truncf %18 : vector<16x256xf32> to vector<16x256xbf16>
    %c0_9 = arith.constant 0 : index
    %c0_10 = arith.constant 0 : index
    %c0_11 = arith.constant 0 : index
    %20 = vector.load %arg4[%c0_9, %c0_10, %c0_11] : memref<6x256x256xbf16, #tpu.memory_space<vmem>>, vector<1x256x256xbf16>
    %21 = vector.shape_cast %20 : vector<1x256x256xbf16> to vector<256x256xbf16>
    %cst_12 = arith.constant dense<0.000000e+00> : vector<16x256xf32>
    %22 = tpu.matmul %19, %21, %cst_12 {dimension_numbers = #tpu.dot_dimension_numbers<[1], [0], [0], [1], [0, 0, 1, 1], [], []>} : vector<16x256xbf16>, vector<256x256xbf16>, vector<16x256xf32> -> vector<16x256xf32>
    %c0_13 = arith.constant 0 : index
    %c0_14 = arith.constant 0 : index
    %c0_15 = arith.constant 0 : index
    %23 = vector.load %arg5[%c0_13, %c0_14, %c0_15] : memref<6x1x256xf32, #tpu.memory_space<vmem>>, vector<1x1x256xf32>
    %24 = vector.shape_cast %23 : vector<1x1x256xf32> to vector<1x256xf32>
    %25 = vector.broadcast %24 : vector<1x256xf32> to vector<16x256xf32>
    %26 = arith.addf %22, %25 : vector<16x256xf32>
    %cst_16 = arith.constant 0.000000e+00 : f32
    %27 = vector.broadcast %cst_16 : f32 to vector<16x256xf32>
    %28 = arith.maximumf %26, %27 : vector<16x256xf32>
    %29 = arith.truncf %28 : vector<16x256xf32> to vector<16x256xbf16>
    %c1 = arith.constant 1 : index
    %c0_17 = arith.constant 0 : index
    %c0_18 = arith.constant 0 : index
    %30 = vector.load %arg4[%c1, %c0_17, %c0_18] : memref<6x256x256xbf16, #tpu.memory_space<vmem>>, vector<1x256x256xbf16>
    %31 = vector.shape_cast %30 : vector<1x256x256xbf16> to vector<256x256xbf16>
    %cst_19 = arith.constant dense<0.000000e+00> : vector<16x256xf32>
    %32 = tpu.matmul %29, %31, %cst_19 {dimension_numbers = #tpu.dot_dimension_numbers<[1], [0], [0], [1], [0, 0, 1, 1], [], []>} : vector<16x256xbf16>, vector<256x256xbf16>, vector<16x256xf32> -> vector<16x256xf32>
    %c1_20 = arith.constant 1 : index
    %c0_21 = arith.constant 0 : index
    %c0_22 = arith.constant 0 : index
    %33 = vector.load %arg5[%c1_20, %c0_21, %c0_22] : memref<6x1x256xf32, #tpu.memory_space<vmem>>, vector<1x1x256xf32>
    %34 = vector.shape_cast %33 : vector<1x1x256xf32> to vector<1x256xf32>
    %35 = vector.broadcast %34 : vector<1x256xf32> to vector<16x256xf32>
    %36 = arith.addf %32, %35 : vector<16x256xf32>
    %cst_23 = arith.constant 0.000000e+00 : f32
    %37 = vector.broadcast %cst_23 : f32 to vector<16x256xf32>
    %38 = arith.maximumf %36, %37 : vector<16x256xf32>
    %39 = arith.truncf %38 : vector<16x256xf32> to vector<16x256xbf16>
    %c2 = arith.constant 2 : index
    %c0_24 = arith.constant 0 : index
    %c0_25 = arith.constant 0 : index
    %40 = vector.load %arg4[%c2, %c0_24, %c0_25] : memref<6x256x256xbf16, #tpu.memory_space<vmem>>, vector<1x256x256xbf16>
    %41 = vector.shape_cast %40 : vector<1x256x256xbf16> to vector<256x256xbf16>
    %cst_26 = arith.constant dense<0.000000e+00> : vector<16x256xf32>
    %42 = tpu.matmul %39, %41, %cst_26 {dimension_numbers = #tpu.dot_dimension_numbers<[1], [0], [0], [1], [0, 0, 1, 1], [], []>} : vector<16x256xbf16>, vector<256x256xbf16>, vector<16x256xf32> -> vector<16x256xf32>
    %c2_27 = arith.constant 2 : index
    %c0_28 = arith.constant 0 : index
    %c0_29 = arith.constant 0 : index
    %43 = vector.load %arg5[%c2_27, %c0_28, %c0_29] : memref<6x1x256xf32, #tpu.memory_space<vmem>>, vector<1x1x256xf32>
    %44 = vector.shape_cast %43 : vector<1x1x256xf32> to vector<1x256xf32>
    %45 = vector.broadcast %44 : vector<1x256xf32> to vector<16x256xf32>
    %46 = arith.addf %42, %45 : vector<16x256xf32>
    %cst_30 = arith.constant 0.000000e+00 : f32
    %47 = vector.broadcast %cst_30 : f32 to vector<16x256xf32>
    %48 = arith.maximumf %46, %47 : vector<16x256xf32>
    %49 = arith.truncf %48 : vector<16x256xf32> to vector<16x256xbf16>
    %c3 = arith.constant 3 : index
    %c0_31 = arith.constant 0 : index
    %c0_32 = arith.constant 0 : index
    %50 = vector.load %arg4[%c3, %c0_31, %c0_32] : memref<6x256x256xbf16, #tpu.memory_space<vmem>>, vector<1x256x256xbf16>
    %51 = vector.shape_cast %50 : vector<1x256x256xbf16> to vector<256x256xbf16>
    %cst_33 = arith.constant dense<0.000000e+00> : vector<16x256xf32>
    %52 = tpu.matmul %49, %51, %cst_33 {dimension_numbers = #tpu.dot_dimension_numbers<[1], [0], [0], [1], [0, 0, 1, 1], [], []>} : vector<16x256xbf16>, vector<256x256xbf16>, vector<16x256xf32> -> vector<16x256xf32>
    %c3_34 = arith.constant 3 : index
    %c0_35 = arith.constant 0 : index
    %c0_36 = arith.constant 0 : index
    %53 = vector.load %arg5[%c3_34, %c0_35, %c0_36] : memref<6x1x256xf32, #tpu.memory_space<vmem>>, vector<1x1x256xf32>
    %54 = vector.shape_cast %53 : vector<1x1x256xf32> to vector<1x256xf32>
    %55 = vector.broadcast %54 : vector<1x256xf32> to vector<16x256xf32>
    %56 = arith.addf %52, %55 : vector<16x256xf32>
    %cst_37 = arith.constant 0.000000e+00 : f32
    %57 = vector.broadcast %cst_37 : f32 to vector<16x256xf32>
    %58 = arith.maximumf %56, %57 : vector<16x256xf32>
    %59 = arith.truncf %58 : vector<16x256xf32> to vector<16x256xbf16>
    %c4 = arith.constant 4 : index
    %c0_38 = arith.constant 0 : index
    %c0_39 = arith.constant 0 : index
    %60 = vector.load %arg4[%c4, %c0_38, %c0_39] : memref<6x256x256xbf16, #tpu.memory_space<vmem>>, vector<1x256x256xbf16>
    %61 = vector.shape_cast %60 : vector<1x256x256xbf16> to vector<256x256xbf16>
    %cst_40 = arith.constant dense<0.000000e+00> : vector<16x256xf32>
    %62 = tpu.matmul %59, %61, %cst_40 {dimension_numbers = #tpu.dot_dimension_numbers<[1], [0], [0], [1], [0, 0, 1, 1], [], []>} : vector<16x256xbf16>, vector<256x256xbf16>, vector<16x256xf32> -> vector<16x256xf32>
    %c4_41 = arith.constant 4 : index
    %c0_42 = arith.constant 0 : index
    %c0_43 = arith.constant 0 : index
    %63 = vector.load %arg5[%c4_41, %c0_42, %c0_43] : memref<6x1x256xf32, #tpu.memory_space<vmem>>, vector<1x1x256xf32>
    %64 = vector.shape_cast %63 : vector<1x1x256xf32> to vector<1x256xf32>
    %65 = vector.broadcast %64 : vector<1x256xf32> to vector<16x256xf32>
    %66 = arith.addf %62, %65 : vector<16x256xf32>
    %cst_44 = arith.constant 0.000000e+00 : f32
    %67 = vector.broadcast %cst_44 : f32 to vector<16x256xf32>
    %68 = arith.maximumf %66, %67 : vector<16x256xf32>
    %69 = arith.truncf %68 : vector<16x256xf32> to vector<16x256xbf16>
    %c5 = arith.constant 5 : index
    %c0_45 = arith.constant 0 : index
    %c0_46 = arith.constant 0 : index
    %70 = vector.load %arg4[%c5, %c0_45, %c0_46] : memref<6x256x256xbf16, #tpu.memory_space<vmem>>, vector<1x256x256xbf16>
    %71 = vector.shape_cast %70 : vector<1x256x256xbf16> to vector<256x256xbf16>
    %cst_47 = arith.constant dense<0.000000e+00> : vector<16x256xf32>
    %72 = tpu.matmul %69, %71, %cst_47 {dimension_numbers = #tpu.dot_dimension_numbers<[1], [0], [0], [1], [0, 0, 1, 1], [], []>} : vector<16x256xbf16>, vector<256x256xbf16>, vector<16x256xf32> -> vector<16x256xf32>
    %c5_48 = arith.constant 5 : index
    %c0_49 = arith.constant 0 : index
    %c0_50 = arith.constant 0 : index
    %73 = vector.load %arg5[%c5_48, %c0_49, %c0_50] : memref<6x1x256xf32, #tpu.memory_space<vmem>>, vector<1x1x256xf32>
    %74 = vector.shape_cast %73 : vector<1x1x256xf32> to vector<1x256xf32>
    %75 = vector.broadcast %74 : vector<1x256xf32> to vector<16x256xf32>
    %76 = arith.addf %72, %75 : vector<16x256xf32>
    %cst_51 = arith.constant 0.000000e+00 : f32
    %77 = vector.broadcast %cst_51 : f32 to vector<16x256xf32>
    %78 = arith.maximumf %76, %77 : vector<16x256xf32>
    %79 = arith.truncf %78 : vector<16x256xf32> to vector<16x256xbf16>
    %c0_52 = arith.constant 0 : index
    %c0_53 = arith.constant 0 : index
    %80 = vector.load %arg6[%c0_52, %c0_53] : memref<256x128xbf16, #tpu.memory_space<vmem>>, vector<256x128xbf16>
    %cst_54 = arith.constant dense<0.000000e+00> : vector<16x128xf32>
    %81 = tpu.matmul %79, %80, %cst_54 {dimension_numbers = #tpu.dot_dimension_numbers<[1], [0], [0], [1], [0, 0, 1, 1], [], []>} : vector<16x256xbf16>, vector<256x128xbf16>, vector<16x128xf32> -> vector<16x128xf32>
    %c0_55 = arith.constant 0 : index
    %c0_56 = arith.constant 0 : index
    %82 = vector.load %arg7[%c0_55, %c0_56] : memref<1x128xf32, #tpu.memory_space<vmem>>, vector<1x128xf32>
    %83 = vector.broadcast %82 : vector<1x128xf32> to vector<16x128xf32>
    %84 = arith.addf %81, %83 : vector<16x128xf32>
    %cst_57 = arith.constant 0.000000e+00 : f32
    %85 = vector.broadcast %cst_57 : f32 to vector<16x128xf32>
    %86 = arith.maximumf %84, %85 : vector<16x128xf32>
    %87 = arith.truncf %86 : vector<16x128xf32> to vector<16x128xbf16>
    %c0_58 = arith.constant 0 : index
    %c0_59 = arith.constant 0 : index
    %88 = vector.load %arg8[%c0_58, %c0_59] : memref<16x128xbf16, #tpu.memory_space<vmem>>, vector<16x128xbf16>
    tpu.vector_store %arg8[%c0_58, %c0_59], %87 {strides = array<i32>} : memref<16x128xbf16, #tpu.memory_space<vmem>>, vector<16x128xbf16>,
    return
  }
  func.func @transform_0(%arg0: i32) -> (i32, i32) {
    %c0_i32 = arith.constant 0 : i32
    %c0_i32_0 = arith.constant 0 : i32
    return %arg0, %c0_i32 : i32, i32
  }
  func.func @transform_1(%arg0: i32) -> (i32, i32) {
    %c0_i32 = arith.constant 0 : i32
    %c0_i32_0 = arith.constant 0 : i32
    %c0_i32_1 = arith.constant 0 : i32
    return %c0_i32, %c0_i32_0 : i32, i32
  }
  func.func @transform_2(%arg0: i32) -> (i32, i32) {
    %c0_i32 = arith.constant 0 : i32
    %c0_i32_0 = arith.constant 0 : i32
    %c0_i32_1 = arith.constant 0 : i32
    return %c0_i32, %c0_i32_0 : i32, i32
  }
  func.func @transform_3(%arg0: i32) -> (i32, i32, i32) {
    %c0_i32 = arith.constant 0 : i32
    %c0_i32_0 = arith.constant 0 : i32
    %c0_i32_1 = arith.constant 0 : i32
    %c0_i32_2 = arith.constant 0 : i32
    return %c0_i32, %c0_i32_0, %c0_i32_1 : i32, i32, i32
  }
  func.func @transform_4(%arg0: i32) -> (i32, i32, i32) {
    %c0_i32 = arith.constant 0 : i32
    %c0_i32_0 = arith.constant 0 : i32
    %c0_i32_1 = arith.constant 0 : i32
    %c0_i32_2 = arith.constant 0 : i32
    return %c0_i32, %c0_i32_0, %c0_i32_1 : i32, i32, i32
  }
  func.func @transform_5(%arg0: i32) -> (i32, i32) {
    %c0_i32 = arith.constant 0 : i32
    %c0_i32_0 = arith.constant 0 : i32
    %c0_i32_1 = arith.constant 0 : i32
    return %c0_i32, %c0_i32_0 : i32, i32
  }
  func.func @transform_6(%arg0: i32) -> (i32, i32) {
    %c0_i32 = arith.constant 0 : i32
    %c0_i32_0 = arith.constant 0 : i32
    %c0_i32_1 = arith.constant 0 : i32
    return %c0_i32, %c0_i32_0 : i32, i32
  }
  func.func @transform_7(%arg0: i32) -> (i32, i32) {
    %c0_i32 = arith.constant 0 : i32
    %c0_i32_0 = arith.constant 0 : i32
    return %arg0, %c0_i32 : i32, i32
  }
}

</mosaic_0001>

<bundles_post_ra>
// kernel: tpu_custom_call.1
= control target key start
LH: loop header
LB: loop body
LE: loop exit
PB: predicated region body
PF: predicated region fallthrough
CT: control target
= control target key end

     0   :  { %12 = vsyncpa [#allocation3], 0  ;;  %s3403_s0 = inlined_call_operand.hbm [shape: f32[16,64], index: 0, kind: input, shape index: {}]   ;;  %s3404_s1 = inlined_call_operand.hbm [shape: bf16[64,256], index: 1, kind: input, shape index: {}]   ;;  %s3405_s2 = inlined_call_operand.hbm [shape: f32[1,256], index: 2, kind: input, shape index: {}]   ;;  %s3406_s3 = inlined_call_operand.hbm [shape: bf16[6,256,256], index: 3, kind: input, shape index: {}]   ;;  %s3407_s4 = inlined_call_operand.hbm [shape: f32[6,1,256], index: 4, kind: input, shape index: {}]   ;;  %s3408_s5 = inlined_call_operand.hbm [shape: bf16[256,128], index: 5, kind: input, shape index: {}]   ;;  %s3409_s6 = inlined_call_operand.vmem [shape: f32[1,128], index: 6, kind: input, shape index: {}]   ;;  %s3410_s7 = inlined_call_operand.hbm [shape: bf16[16,128], index: 7, kind: output, shape index: {}]  }
   0x1   :  { %13 = vsyncpa [#allocation6], 0 }
   0x2   :  { %14 = vsyncpa [#allocation9], 0 }
   0x3   :  { %15 = vsyncpa [#allocation12], 0 }
   0x4   :  { %16 = vsyncpa [#allocation4], 0  ;;  %s34_s26 = sshll.u32 %s3404_s1, 4  ;;  %s3300_s27 = smov [#allocation5]   ;;  %s35_s26 = int_to_ptr.hbm [resolvable:$true] %s34_s26 }
   0x5   :  { %s36_s28 = sshll.u32 %s3300_s27, 4  ;;  %s58_s8 = sshll.u32 %s3406_s3, 4  ;;  %s37_s28 = int_to_ptr.vmem [resolvable:$true] %s36_s28  ;;  %s59_s8 = int_to_ptr.hbm [resolvable:$true] %s58_s8 }
   0x6   :  { %s3301_s9 = smov 128   ;;  %s3302_s10 = smov 8  }
   0x7   :  { %42 = dma.hbm_to_vmem [thread:$0]  %s35_s26, 1024, %s37_s28, [#allocation6], %s3301_s9, %s3301_s9, %s3302_s10  }
   0x8   :  { %s3303_s11 = smov [#allocation8]   ;;  %s21_s15 = sshll.u32 %s3403_s0, 4  ;;  %s22_s15 = int_to_ptr.hbm [resolvable:$true] %s21_s15 }
   0x9   :  { %s60_s12 = sshll.u32 %s3303_s11, 4  ;;  %s48_s17 = sshll.u32 %s3405_s2, 4  ;;  %s61_s12 = int_to_ptr.vmem [resolvable:$true] %s60_s12  ;;  %s49_s17 = int_to_ptr.hbm [resolvable:$true] %s48_s17 }
   0xa   :  { %66 = dma.hbm_to_vmem [thread:$0]  %s59_s8, 24576, %s61_s12, [#allocation9], %s3301_s9, %s3301_s9, %s3302_s10  }
   0xb   :  { %s3304_s18 = smov [#allocation2]   ;;  %s3305_s3 = smov [#allocation7]  }
   0xc   :  { %s23_s19 = sshll.u32 %s3304_s18, 4  ;;  %s50_s20 = sshll.u32 %s3305_s3, 4  ;;  %s24_s19 = int_to_ptr.vmem [resolvable:$true] %s23_s19  ;;  %s51_s20 = int_to_ptr.vmem [resolvable:$true] %s50_s20 }
   0xd   :  { %29 = dma.hbm_to_vmem [thread:$0]  %s22_s15, 256, %s24_s19, [#allocation3], %s3301_s9, %s3301_s9, %s3302_s10  }
   0xe   :  { %s71_s23 = sshll.u32 %s3407_s4, 4  ;;  %s3306_s0 = smov [#allocation10]   ;;  %s72_s23 = int_to_ptr.hbm [resolvable:$true] %s71_s23 }
   0xf   :  { %53 = dma.hbm_to_vmem [thread:$0]  %s49_s17, 32, %s51_s20, [#allocation6]  }
  0x10   :  { %s73_s24 = sshll.u32 %s3306_s0, 4  ;;  %s84_s2 = sshll.u32 %s3408_s5, 4  ;;  %s74_s24 = int_to_ptr.vmem [resolvable:$true] %s73_s24  ;;  %s85_s2 = int_to_ptr.hbm [resolvable:$true] %s84_s2 }
  0x11   :  { %s3307_s27 = smov 32   ;;  %s3308_s28 = smov 2  }
  0x12   :  { %79 = dma.hbm_to_vmem [thread:$0]  %s72_s23, 192, %s74_s24, [#allocation9], %s3307_s27, %s3307_s27, %s3308_s28  }
  0x13   :  { %s3309_s29 = smov [#allocation11]   ;;  %s3310_s8 = smov 64  }
  0x14   :  { %s86_s30 = sshll.u32 %s3309_s29, 4  ;;  %s3311_s9 = smov 4   ;;  %s87_s30 = int_to_ptr.vmem [resolvable:$true] %s86_s30 }
  0x15   :  { %92 = dma.hbm_to_vmem [thread:$0]  %s85_s2, 2048, %s87_s30, [#allocation12], %s3310_s8, %s3310_s8, %s3311_s9  }
  0x16   :  { %3290 = dma.done.wait [#allocation3], 256  }
  0x17   :  { %3291 = vsyncadd [#allocation3], 4294967040 }
  0x18   :  { %3292 = dma.done.wait [#allocation6], 1056  }
  0x19   :  { %3293 = vsyncadd [#allocation6], 4294966240 }
  0x1a   :  { %3294 = dma.done.wait [#allocation9], 24768  }
  0x1b   :  { %3295 = vsyncadd [#allocation9], 4294942528 }
  0x1c   :  { %3296 = dma.done.wait [#allocation12], 2048  }
  0x1d   :  { %3297 = vsyncadd [#allocation12], 4294965248  ;;  %v3375_v0 = vld [vmem:[#allocation2] sm:$0xff]  ;;  %vm124_vm0 = vcmask 523264   ;;  %v3379_v2 = vld [vmem:[#allocation2 + $0x8] sm:$0xff]  ;;  %v3312_v6 = vmov 64.0  }
  0x1e   :  { %v122_v1 = vmul.f32 %v3375_v0, %v3375_v0  ;;  %v123_v4 = vmul.f32 %v3379_v2, %v3379_v2  ;;  %3116 = vrcp.f32 %v3312_v6  ;;  %v2040_v9 = vld [vmem:[#allocation5 + $0x30] sm:$0xf]  ;;  %v2887_v10 = vld [vmem:[#allocation5 + $0x34] sm:$0xf0]  ;;  %v2886_v11 = vld [vmem:[#allocation5 + $0x34] sm:$0xf] }
  0x1f   :  { %v2041_v13 = vor.u32 %v2887_v10, %v2040_v9  ;;  %v2042_v14 = vld [vmem:[#allocation5 + $0x38] sm:$0xf0]  ;;  %v2032_v16 = vld [vmem:[#allocation5 + $0x20] sm:$0xf]  ;;  %v2885_v17 = vld [vmem:[#allocation5 + $0x24] sm:$0xf0] }
  0x20   :  { %v125_v3 = vsel %vm124_vm0, %v122_v1, 0.0  ;;  %v128_v5 = vsel %vm124_vm0, %v123_v4, 0.0  ;;  %v2045_v15 = vor.u32 %v2886_v11, %v2042_v14  ;;  %v2884_v18 = vld [vmem:[#allocation5 + $0x24] sm:$0xf]  ;;  %v2033_v20 = vor.u32 %v2885_v17, %v2032_v16  ;;  %v2034_v21 = vld [vmem:[#allocation5 + $0x28] sm:$0xf0] }
  0x21   :  { %126 = vadd.xlane.f32.xlu0 %v125_v3  ;;  %226 = vmatpush.bf16.msra.mxu0 %v2041_v13  ;;  %v2037_v22 = vor.u32 %v2884_v18, %v2034_v21  ;;  %v2024_v23 = vld [vmem:[#allocation5 + $0x10] sm:$0xf]  ;;  %v2883_v24 = vld [vmem:[#allocation5 + $0x14] sm:$0xf0]  ;;  %v2882_v25 = vld [vmem:[#allocation5 + $0x14] sm:$0xf] }
  0x22   :  { %240 = vmatpush.bf16.msra.mxu1 %v2045_v15  ;;  %v2025_v27 = vor.u32 %v2883_v24, %v2024_v23  ;;  %v2026_v28 = vld [vmem:[#allocation5 + $0x18] sm:$0xf0]  ;;  %v2016_v30 = vld [vmem:[#allocation5] sm:$0xf]  ;;  %v2881_v31 = vld [vmem:[#allocation5 + $0x4] sm:$0xf0] }
  0x23   :  { %v2029_v29 = vor.u32 %v2882_v25, %v2026_v28  ;;  %v2880_v32 = vld [vmem:[#allocation5 + $0x4] sm:$0xf]  ;;  %v2017_v33 = vor.u32 %v2881_v31, %v2016_v30  ;;  %v2018_v34 = vld [vmem:[#allocation5 + $0x8] sm:$0xf0]  ;;  %v2106_v40 = vld [vmem:[#allocation8 + $0x70] sm:$0xf] }
  0x24   :  { %v3117_v7 = vpop.eup %3116  ;;  %v2021_v36 = vor.u32 %v2880_v32, %v2018_v34  ;;  %v2903_v41 = vld [vmem:[#allocation8 + $0x74] sm:$0xf0]  ;;  %v2170_v43 = vld [vmem:[#allocation8 + $0xf0] sm:$0xf]  ;;  %v2902_v45 = vld [vmem:[#allocation8 + $0x74] sm:$0xf] }
  0x25   :  { %v132_v8 = vmul.f32 64.0, %v3117_v7  ;;  %227 = vmatpush.bf16.msra.mxu0 %v2033_v20  ;;  %vm136_vm1 = vweird.f32 %v3117_v7  ;;  %v2107_v42 = vor.u32 %v2903_v41, %v2106_v40  ;;  %v2919_v44 = vld [vmem:[#allocation8 + $0xf4] sm:$0xf0]  ;;  %v2108_v47 = vld [vmem:[#allocation8 + $0x78] sm:$0xf0]  ;;  %s3313_s10 = smov [#allocation13]  }
  0x26   :  { %241 = vmatpush.bf16.msra.mxu1 %v2037_v22  ;;  %v2171_v46 = vor.u32 %v2919_v44, %v2170_v43  ;;  %v2918_v48 = vld [vmem:[#allocation8 + $0xf4] sm:$0xf]  ;;  %v2172_v49 = vld [vmem:[#allocation8 + $0xf8] sm:$0xf0]  ;;  %v2111_v50 = vor.u32 %v2902_v45, %v2108_v47  ;;  %v2098_v52 = vld [vmem:[#allocation8 + $0x60] sm:$0xf] }
  0x27   :  { %v133_v12 = vsub.f32 1.0, %v132_v8  ;;  %454 = vmatpush.bf16.msra.mxu2 %v2107_v42  ;;  %v2175_v51 = vor.u32 %v2918_v48, %v2172_v49  ;;  %v2901_v53 = vld [vmem:[#allocation8 + $0x64] sm:$0xf0]  ;;  %v2162_v54 = vld [vmem:[#allocation8 + $0xe0] sm:$0xf]  ;;  %s1996_s11 = sshll.u32 %s3313_s10, 4  ;;  %s1997_s11 = int_to_ptr.vmem [resolvable:$true] %s1996_s11 }
  0x28   :  { %468 = vmatpush.bf16.msra.mxu3 %v2171_v46  ;;  %v2099_v55 = vor.u32 %v2901_v53, %v2098_v52  ;;  %v2917_v56 = vld [vmem:[#allocation8 + $0xe4] sm:$0xf0]  ;;  %v2900_v57 = vld [vmem:[#allocation8 + $0x64] sm:$0xf]  ;;  %v2100_v58 = vld [vmem:[#allocation8 + $0x68] sm:$0xf0] }
  0x29   :  { %129 = vadd.xlane.f32.xlu0 %v128_v5  ;;  %v134_v19 = vmul.f32 %v3117_v7, %v133_v12  ;;  %228 = vmatpush.bf16.msra.mxu0 %v2025_v27  ;;  %v2163_v60 = vor.u32 %v2917_v56, %v2162_v54  ;;  %v2103_v61 = vor.u32 %v2900_v57, %v2100_v58  ;;  %v2916_v62 = vld [vmem:[#allocation8 + $0xe4] sm:$0xf]  ;;  %v2164_v63 = vld [vmem:[#allocation8 + $0xe8] sm:$0xf0]  ;;  %v2090_v1 = vld [vmem:[#allocation8 + $0x50] sm:$0xf] }
  0x2a   :  { %242 = vmatpush.bf16.msra.mxu1 %v2029_v29  ;;  %v2167_v4 = vor.u32 %v2916_v62, %v2164_v63  ;;  %v2899_v5 = vld [vmem:[#allocation8 + $0x54] sm:$0xf0]  ;;  %v2154_v6 = vld [vmem:[#allocation8 + $0xd0] sm:$0xf]  ;;  %v2898_v9 = vld [vmem:[#allocation8 + $0x54] sm:$0xf] }
  0x2b   :  { %v135_v26 = vadd.f32 %v3117_v7, %v134_v19  ;;  %455 = vmatpush.bf16.msra.mxu2 %v2099_v55  ;;  %v2091_v8 = vor.u32 %v2899_v5, %v2090_v1  ;;  %v2092_v10 = vld [vmem:[#allocation8 + $0x58] sm:$0xf0]  ;;  %v2914_v11 = vld [vmem:[#allocation8 + $0xd4] sm:$0xf]  ;;  %v2082_v16 = vld [vmem:[#allocation8 + $0x40] sm:$0xf] }
  0x2c   :  { %469 = vmatpush.bf16.msra.mxu3 %v2163_v60  ;;  %v2156_v15 = vld [vmem:[#allocation8 + $0xd8] sm:$0xf0]  ;;  %v2095_v18 = vor.u32 %v2898_v9, %v2092_v10  ;;  %v2897_v20 = vld [vmem:[#allocation8 + $0x44] sm:$0xf0]  ;;  %v2146_v21 = vld [vmem:[#allocation8 + $0xc0] sm:$0xf] }
  0x2d   :  { %v137_v35 = vsel %vm136_vm1, %v3117_v7, %v135_v26  ;;  %229 = vmatpush.bf16.msra.mxu0 %v2017_v33  ;;  %v2915_v7 = vld [vmem:[#allocation8 + $0xd4] sm:$0xf0]  ;;  %v2159_v19 = vor.u32 %v2914_v11, %v2156_v15  ;;  %v2913_v22 = vld [vmem:[#allocation8 + $0xc4] sm:$0xf0]  ;;  %v2896_v23 = vld [vmem:[#allocation8 + $0x44] sm:$0xf]  ;;  %v2083_v26 = vor.u32 %v2897_v20, %v2082_v16 }
  0x2e   :  { %243 = vmatpush.bf16.msra.mxu1 %v2021_v36  ;;  %v2155_v14 = vor.u32 %v2915_v7, %v2154_v6  ;;  %v2084_v24 = vld [vmem:[#allocation8 + $0x48] sm:$0xf0]  ;;  %v2912_v27 = vld [vmem:[#allocation8 + $0xc4] sm:$0xf]  ;;  %v2147_v29 = vor.u32 %v2913_v22, %v2146_v21  ;;  %v2074_v47 = vld [vmem:[#allocation8 + $0x30] sm:$0xf] }
  0x2f   :  { %456 = vmatpush.bf16.msra.mxu2 %v2091_v8  ;;  %v2148_v28 = vld [vmem:[#allocation8 + $0xc8] sm:$0xf0]  ;;  %v2087_v31 = vor.u32 %v2896_v23, %v2084_v24  ;;  %v2895_v48 = vld [vmem:[#allocation8 + $0x34] sm:$0xf0]  ;;  %v2076_v52 = vld [vmem:[#allocation8 + $0x38] sm:$0xf0] }
  0x30   :  { %470 = vmatpush.bf16.msra.mxu3 %v2155_v14  ;;  %v2151_v32 = vor.u32 %v2912_v27, %v2148_v28  ;;  %v2075_v49 = vor.u32 %v2895_v48, %v2074_v47  ;;  %v2910_v55 = vld [vmem:[#allocation8 + $0xb4] sm:$0xf]  ;;  %v2140_v56 = vld [vmem:[#allocation8 + $0xb8] sm:$0xf0]  ;;  %v2893_v57 = vld [vmem:[#allocation8 + $0x24] sm:$0xf0] }
  0x31   :  { %482 = vmatpush.bf16.msrb.mxu0 %v2111_v50  ;;  %v2911_v50 = vld [vmem:[#allocation8 + $0xb4] sm:$0xf0]  ;;  %v2130_v58 = vld [vmem:[#allocation8 + $0xa0] sm:$0xf]  ;;  %v2909_v60 = vld [vmem:[#allocation8 + $0xa4] sm:$0xf0] }
  0x32   :  { %496 = vmatpush.bf16.msrb.mxu1 %v2175_v51  ;;  %v2894_v51 = vld [vmem:[#allocation8 + $0x34] sm:$0xf]  ;;  %v2068_v62 = vld [vmem:[#allocation8 + $0x28] sm:$0xf0]  ;;  %v2131_v63 = vor.u32 %v2909_v60, %v2130_v58  ;;  %v2058_v6 = vld [vmem:[#allocation8 + $0x10] sm:$0xf] }
  0x33   :  { %457 = vmatpush.bf16.msra.mxu2 %v2083_v26  ;;  %v2079_v54 = vor.u32 %v2894_v51, %v2076_v52  ;;  %v2891_v7 = vld [vmem:[#allocation8 + $0x14] sm:$0xf0]  ;;  %v2122_v8 = vld [vmem:[#allocation8 + $0x90] sm:$0xf]  ;;  %v2890_v11 = vld [vmem:[#allocation8 + $0x14] sm:$0xf] }
  0x34   :  { %471 = vmatpush.bf16.msra.mxu3 %v2147_v29  ;;  %v2059_v9 = vor.u32 %v2891_v7, %v2058_v6  ;;  %v2907_v10 = vld [vmem:[#allocation8 + $0x94] sm:$0xf0]  ;;  %v2906_v15 = vld [vmem:[#allocation8 + $0x94] sm:$0xf]  ;;  %v2124_v16 = vld [vmem:[#allocation8 + $0x98] sm:$0xf0] }
  0x35   :  { %483 = vmatpush.bf16.msrb.mxu0 %v2103_v61  ;;  %v2892_v61 = vld [vmem:[#allocation8 + $0x24] sm:$0xf]  ;;  %v2114_v20 = vld [vmem:[#allocation8 + $0x80] sm:$0xf]  ;;  %v2905_v22 = vld [vmem:[#allocation8 + $0x84] sm:$0xf0] }
  0x36   :  { %497 = vmatpush.bf16.msrb.mxu1 %v2167_v4  ;;  %v2071_v1 = vor.u32 %v2892_v61, %v2068_v62  ;;  %v2132_v4 = vld [vmem:[#allocation8 + $0xa8] sm:$0xf0]  ;;  %v2888_v23 = vld [vmem:[#allocation8 + $0x4] sm:$0xf]  ;;  %v2284_v51 = vld [vmem:[#allocation8 + $0x1d8] sm:$0xf0] }
  0x37   :  { %458 = vmatpush.bf16.msra.mxu2 %v2075_v49  ;;  %v2052_v24 = vld [vmem:[#allocation8 + $0x8] sm:$0xf0]  ;;  %v2904_v27 = vld [vmem:[#allocation8 + $0x84] sm:$0xf]  ;;  %v2947_v49 = vld [vmem:[#allocation8 + $0x1d4] sm:$0xf0] }
  0x38   :  { %v2055_v26 = vor.u32 %v2888_v23, %v2052_v24  ;;  %v2116_v28 = vld [vmem:[#allocation8 + $0x88] sm:$0xf0]  ;;  %v2226_v52 = vld [vmem:[#allocation8 + $0x160] sm:$0xf]  ;;  %v2944_v60 = vld [vmem:[#allocation8 + $0x1c4] sm:$0xf] }
  0x39   :  { %484 = vmatpush.bf16.msrb.mxu0 %v2095_v18  ;;  %v2050_v18 = vld [vmem:[#allocation8] sm:$0xf]  ;;  %v2119_v29 = vor.u32 %v2904_v27, %v2116_v28  ;;  %v2276_v61 = vld [vmem:[#allocation8 + $0x1c8] sm:$0xf0]  ;;  %v2220_v23 = vld [vmem:[#allocation8 + $0x158] sm:$0xf0] }
  0x3a   :  { %498 = vmatpush.bf16.msrb.mxu1 %v2159_v19  ;;  %v2889_v19 = vld [vmem:[#allocation8 + $0x4] sm:$0xf0]  ;;  %v2274_v58 = vld [vmem:[#allocation8 + $0x1c0] sm:$0xf]  ;;  %v2942_v27 = vld [vmem:[#allocation8 + $0x1b4] sm:$0xf] }
  0x3b   :  { %v2051_v21 = vor.u32 %v2889_v19, %v2050_v18  ;;  %v2218_v19 = vld [vmem:[#allocation8 + $0x150] sm:$0xf]  ;;  %s1998_s14 = sshll.u32 %s3410_s7, 4  ;;  %s1999_s14 = int_to_ptr.hbm [resolvable:$true] %s1998_s14 }
  0x3d   :  { %485 = vmatpush.bf16.msrb.mxu0 %v2087_v31  ;;  %v2951_v31 = vld [vmem:[#allocation8 + $0x1f4] sm:$0xf0] }
  0x3e   :  { %499 = vmatpush.bf16.msrb.mxu1 %v2151_v32  ;;  %v2950_v32 = vld [vmem:[#allocation8 + $0x1f4] sm:$0xf] }
  0x41   :  { %486 = vmatpush.bf16.msrb.mxu0 %v2079_v54 }
  0x45   :  { %487 = vmatpush.bf16.msrb.mxu0 %v2071_v1  ;;  %v173_v1 = vld [vmem:[#allocation7] sm:$0x3] }
  0x46   :  { %v176_v6 = vperm.slane %v173_v1, 1 }
  0x94   :  { %v127_v37 = vpop.xlane.xlu0 %126 }
  0x95   :  { %v138_v38 = vmul.f32 %v137_v35, %v127_v37 }
  0x97   :  { %v3385_v39 = vadd.f32 1e-08, %v138_v38 }
  0x99   :  { %3118 = vrsqrt.f32 %v3385_v39  ;;  %vm148_vm3 = vweird.f32 %v3385_v39 }
  0x9c   :  { %v130_v59 = vpop.xlane.xlu0 %129 }
  0x9d   :  { %v139_v3 = vmul.f32 %v137_v35, %v130_v59 }
  0x9f   :  { %v3119_v12 = vpop.eup %3118  ;;  %v141_v13 = vadd.f32 1e-08, %v139_v3  ;;  %v2908_v3 = vld [vmem:[#allocation8 + $0xa4] sm:$0xf] }
  0xa0   :  { %v143_v17 = vmul.f32 %v3119_v12, %v3385_v39  ;;  %vm149_vm2 = vweird.f32 %v3119_v12  ;;  %v2138_v39 = vld [vmem:[#allocation8 + $0xb0] sm:$0xf]  ;;  %v2135_v5 = vor.u32 %v2908_v3, %v2132_v4 }
  0xa1   :  { %3120 = vrsqrt.f32 %v141_v13  ;;  %vm150_vm5 = vmor %vm148_vm3, %vm149_vm2  ;;  %vm158_vm6 = vweird.f32 %v141_v13  ;;  %v2139_v53 = vor.u32 %v2911_v50, %v2138_v39  ;;  %v2282_v39 = vld [vmem:[#allocation8 + $0x1d0] sm:$0xf]  ;;  %v2946_v50 = vld [vmem:[#allocation8 + $0x1d4] sm:$0xf] }
  0xa2   :  { %v144_v25 = vmul.f32 %v3119_v12, %v143_v17  ;;  %v2127_v17 = vor.u32 %v2906_v15, %v2124_v16 }
  0xa3   :  { %472 = vmatpush.bf16.msra.mxu3 %v2139_v53  ;;  %v2933_v53 = vld [vmem:[#allocation8 + $0x164] sm:$0xf0] }
  0xa4   :  { %v145_v30 = vmul.f32 0.5, %v144_v25  ;;  %v2115_v25 = vor.u32 %v2905_v22, %v2114_v20  ;;  %v2227_v54 = vor.u32 %v2933_v53, %v2226_v52  ;;  %v2931_v20 = vld [vmem:[#allocation8 + $0x154] sm:$0xf0]  ;;  %v2252_v53 = vld [vmem:[#allocation8 + $0x198] sm:$0xf0] }
  0xa5   :  { %v2219_v22 = vor.u32 %v2931_v20, %v2218_v19  ;;  %v2428_v19 = vld [vmem:[#allocation8 + $0x2f8] sm:$0xf0]  ;;  %v2418_v20 = vld [vmem:[#allocation8 + $0x2e0] sm:$0xf] }
  0xa6   :  { %v146_v34 = vsub.f32 1.5, %v145_v30  ;;  %v2298_v30 = vld [vmem:[#allocation8 + $0x1f0] sm:$0xf] }
  0xa7   :  { %v3121_v33 = vpop.eup %3120  ;;  %473 = vmatpush.bf16.msra.mxu3 %v2131_v63  ;;  %v2279_v63 = vor.u32 %v2944_v60, %v2276_v61  ;;  %v2937_v60 = vld [vmem:[#allocation8 + $0x184] sm:$0xf0]  ;;  %v2936_v61 = vld [vmem:[#allocation8 + $0x184] sm:$0xf] }
  0xa8   :  { %v153_v35 = vmul.f32 %v3121_v33, %v141_v13  ;;  %v147_v37 = vmul.f32 %v3119_v12, %v146_v34  ;;  %vm159_vm4 = vweird.f32 %v3121_v33  ;;  %v2123_v13 = vor.u32 %v2907_v10, %v2122_v8  ;;  %v2300_v34 = vld [vmem:[#allocation8 + $0x1f8] sm:$0xf0] }
  0xa9   :  { %vm160_vm7 = vmor %vm158_vm6, %vm159_vm4 }
  0xaa   :  { %v154_v36 = vmul.f32 %v3121_v33, %v153_v35  ;;  %v151_v42 = vsel %vm150_vm5, %v3119_v12, %v147_v37  ;;  %v2060_v12 = vld [vmem:[#allocation8 + $0x18] sm:$0xf0]  ;;  %v2290_v35 = vld [vmem:[#allocation8 + $0x1e0] sm:$0xf]  ;;  %v2303_v37 = vor.u32 %v2950_v32, %v2300_v34  ;;  %v2929_v32 = vld [vmem:[#allocation8 + $0x144] sm:$0xf0] }
  0xab   :  { %v162_v44 = vmul.f32 %v151_v42, %v3375_v0  ;;  %v2143_v0 = vor.u32 %v2910_v55, %v2140_v56  ;;  %v2063_v14 = vor.u32 %v2890_v11, %v2060_v12  ;;  %474 = vmatpush.bf16.msra.mxu3 %v2123_v13  ;;  %v2932_v55 = vld [vmem:[#allocation8 + $0x164] sm:$0xf]  ;;  %v2228_v56 = vld [vmem:[#allocation8 + $0x168] sm:$0xf0] }
  0xac   :  { %v155_v38 = vmul.f32 0.5, %v154_v36  ;;  %v2949_v36 = vld [vmem:[#allocation8 + $0x1e4] sm:$0xf0] }
  0xad   :  { %500 = vmatpush.bf16.msrb.mxu1 %v2143_v0  ;;  %488 = vmatpush.bf16.msrb.mxu0 %v2063_v14  ;;  %v2291_v42 = vor.u32 %v2949_v36, %v2290_v35  ;;  %v2283_v0 = vor.u32 %v2947_v49, %v2282_v39  ;;  %v2212_v35 = vld [vmem:[#allocation8 + $0x148] sm:$0xf0]  ;;  %v2250_v49 = vld [vmem:[#allocation8 + $0x190] sm:$0xf] }
  0xae   :  { %v156_v40 = vsub.f32 1.5, %v155_v38  ;;  %v2948_v38 = vld [vmem:[#allocation8 + $0x1e4] sm:$0xf] }
  0xaf   :  { %475 = vmatpush.bf16.msra.mxu3 %v2115_v25  ;;  %v2266_v25 = vld [vmem:[#allocation8 + $0x1b0] sm:$0xf] }
  0xb0   :  { %v157_v41 = vmul.f32 %v3121_v33, %v156_v40  ;;  %v2292_v40 = vld [vmem:[#allocation8 + $0x1e8] sm:$0xf0] }
  0xb1   :  { %501 = vmatpush.bf16.msrb.mxu1 %v2135_v5  ;;  %489 = vmatpush.bf16.msrb.mxu0 %v2055_v26  ;;  %v175_v5 = vperm.slane %v173_v1, 0  ;;  %v2943_v26 = vld [vmem:[#allocation8 + $0x1b4] sm:$0xf0] }
  0xb2   :  { %v161_v43 = vsel %vm160_vm7, %v3121_v33, %v157_v41  ;;  %v2299_v33 = vor.u32 %v2951_v31, %v2298_v30  ;;  %v2234_v41 = vld [vmem:[#allocation8 + $0x170] sm:$0xf]  ;;  %v2267_v28 = vor.u32 %v2943_v26, %v2266_v25  ;;  %v2210_v31 = vld [vmem:[#allocation8 + $0x140] sm:$0xf] }
  0xb3   :  { %v163_v45 = vmul.f32 %v161_v43, %v3379_v2  ;;  %v2066_v2 = vld [vmem:[#allocation8 + $0x20] sm:$0xf]  ;;  %v2935_v43 = vld [vmem:[#allocation8 + $0x174] sm:$0xf0]  ;;  %v2211_v34 = vor.u32 %v2929_v32, %v2210_v31  ;;  %v2362_v25 = vld [vmem:[#allocation8 + $0x270] sm:$0xf] }
  0xb4   :  { %v2067_v59 = vor.u32 %v2893_v57, %v2066_v2  ;;  %730 = vmatpush.bf16.msrb.mxu3 %v2299_v33  ;;  %v2235_v47 = vor.u32 %v2935_v43, %v2234_v41  ;;  %v2231_v2 = vor.u32 %v2932_v55, %v2228_v56  ;;  %v2287_v57 = vor.u32 %v2946_v50, %v2284_v51  ;;  %v2928_v33 = vld [vmem:[#allocation8 + $0x144] sm:$0xf]  ;;  %v2939_v50 = vld [vmem:[#allocation8 + $0x194] sm:$0xf0]  ;;  %v2938_v51 = vld [vmem:[#allocation8 + $0x194] sm:$0xf] }
  0xb5   :  { %v164_v46 = vpack.c.bf16 %v163_v45, %v162_v44  ;;  %502 = vmatpush.bf16.msrb.mxu1 %v2127_v17  ;;  %v2934_v44 = vld [vmem:[#allocation8 + $0x174] sm:$0xf]  ;;  %v2236_v45 = vld [vmem:[#allocation8 + $0x178] sm:$0xf0]  ;;  %v2215_v36 = vor.u32 %v2928_v33, %v2212_v35  ;;  %v2251_v52 = vor.u32 %v2939_v50, %v2250_v49  ;;  %v2194_v55 = vld [vmem:[#allocation8 + $0x120] sm:$0xf] }
  0xb6   :  { %459 = vmatpush.bf16.msra.mxu2 %v2067_v59  ;;  %v2239_v48 = vor.u32 %v2934_v44, %v2236_v45  ;;  %v2945_v59 = vld [vmem:[#allocation8 + $0x1c4] sm:$0xf0]  ;;  %v2202_v44 = vld [vmem:[#allocation8 + $0x130] sm:$0xf]  ;;  %v2927_v45 = vld [vmem:[#allocation8 + $0x134] sm:$0xf0] }
  0xb7   :  { %2046 = vmatmul.msk.bf16.vlgmr.msra.gmra.mxu0 %vm124_vm0, %v164_v46  ;;  %2047 = vmatmul.msk.bf16.vlgmr.msra.gmra.mxu1 %vm124_vm0, %v164_v46  ;;  %v2295_v46 = vor.u32 %v2948_v38, %v2292_v40  ;;  %v2275_v62 = vor.u32 %v2945_v59, %v2274_v58  ;;  %v2941_v38 = vld [vmem:[#allocation8 + $0x1a4] sm:$0xf0]  ;;  %v2940_v40 = vld [vmem:[#allocation8 + $0x1a4] sm:$0xf]  ;;  %v2242_v59 = vld [vmem:[#allocation8 + $0x180] sm:$0xf] }
  0xb8   :  { %744 = vmatpush.bf16.msra.mxu0 %v2239_v48  ;;  %731 = vmatpush.bf16.msrb.mxu3 %v2291_v42  ;;  %v2260_v42 = vld [vmem:[#allocation8 + $0x1a8] sm:$0xf0]  ;;  %v2204_v48 = vld [vmem:[#allocation8 + $0x138] sm:$0xf0]  ;;  %v2925_v56 = vld [vmem:[#allocation8 + $0x124] sm:$0xf0] }
  0xb9   :  { %503 = vmatpush.bf16.msrb.mxu1 %v2119_v29  ;;  %v2268_v29 = vld [vmem:[#allocation8 + $0x1b8] sm:$0xf0]  ;;  %v2263_v43 = vor.u32 %v2940_v40, %v2260_v42  ;;  %v288_v33 = vld [vmem:[#allocation10] sm:$0x3] }
  0xba   :  { %460 = vmatpush.bf16.msra.mxu2 %v2059_v9  ;;  %v2271_v30 = vor.u32 %v2942_v27, %v2268_v29  ;;  %v2967_v27 = vld [vmem:[#allocation8 + $0x274] sm:$0xf0]  ;;  %v2364_v29 = vld [vmem:[#allocation8 + $0x278] sm:$0xf0] }
  0xbb   :  { %v2363_v31 = vor.u32 %v2967_v27, %v2362_v25  ;;  %v2961_v25 = vld [vmem:[#allocation8 + $0x244] sm:$0xf0] }
  0xbc   :  { %745 = vmatpush.bf16.msra.mxu0 %v2231_v2  ;;  %732 = vmatpush.bf16.msrb.mxu3 %v2283_v0  ;;  %v2924_v0 = vld [vmem:[#allocation8 + $0x124] sm:$0xf]  ;;  %v2195_v2 = vor.u32 %v2925_v56, %v2194_v55 }
  0xbd   :  { %758 = vmatpush.bf16.msra.mxu1 %v2303_v37  ;;  %v2258_v37 = vld [vmem:[#allocation8 + $0x1a0] sm:$0xf] }
  0xbe   :  { %461 = vmatpush.bf16.msra.mxu2 %v2051_v21  ;;  %v2930_v21 = vld [vmem:[#allocation8 + $0x154] sm:$0xf]  ;;  %v2259_v41 = vor.u32 %v2941_v38, %v2258_v37 }
  0xbf   :  { %v2223_v24 = vor.u32 %v2930_v21, %v2220_v23  ;;  %v2981_v21 = vld [vmem:[#allocation8 + $0x2e4] sm:$0xf0]  ;;  %v2980_v23 = vld [vmem:[#allocation8 + $0x2e4] sm:$0xf] }
  0xc0   :  { %733 = vmatpush.bf16.msrb.mxu3 %v2275_v62  ;;  %v2243_v62 = vor.u32 %v2937_v60, %v2242_v59  ;;  %v2419_v26 = vor.u32 %v2981_v21, %v2418_v20  ;;  %v2412_v60 = vld [vmem:[#allocation8 + $0x2d8] sm:$0xf0]  ;;  %v2974_v21 = vld [vmem:[#allocation8 + $0x2b4] sm:$0xf] }
  0xc1   :  { %759 = vmatpush.bf16.msra.mxu1 %v2295_v46  ;;  %746 = vmatpush.bf16.msra.mxu0 %v2223_v24  ;;  %v2203_v46 = vor.u32 %v2927_v45, %v2202_v44  ;;  %v2420_v24 = vld [vmem:[#allocation8 + $0x2e8] sm:$0xf0] }
  0xc2   :  { %716 = vmatpush.bf16.msrb.mxu2 %v2235_v47  ;;  %v2926_v47 = vld [vmem:[#allocation8 + $0x134] sm:$0xf] }
  0xc3   :  { %v2207_v39 = vor.u32 %v2926_v47, %v2204_v48 }
  0xc4   :  { %734 = vmatpush.bf16.msrb.mxu3 %v2267_v28  ;;  %v2966_v28 = vld [vmem:[#allocation8 + $0x274] sm:$0xf] }
  0xc5   :  { %760 = vmatpush.bf16.msra.mxu1 %v2287_v57  ;;  %747 = vmatpush.bf16.msra.mxu0 %v2215_v36  ;;  %v2196_v57 = vld [vmem:[#allocation8 + $0x128] sm:$0xf0]  ;;  %v2367_v32 = vor.u32 %v2966_v28, %v2364_v29  ;;  %v291_v36 = vperm.slane %v288_v33, 1 }
  0xc6   :  { %717 = vmatpush.bf16.msrb.mxu2 %v2227_v54  ;;  %v2255_v54 = vor.u32 %v2938_v51, %v2252_v53  ;;  %v2199_v58 = vor.u32 %v2924_v0, %v2196_v57  ;;  %v2979_v57 = vld [vmem:[#allocation8 + $0x2d4] sm:$0xf0]  ;;  %v2340_v28 = vld [vmem:[#allocation8 + $0x248] sm:$0xf0] }
  0xc8   :  { %735 = vmatpush.bf16.msrb.mxu3 %v2259_v41  ;;  %v290_v41 = vperm.slane %v288_v33, 0 }
  0xc9   :  { %761 = vmatpush.bf16.msra.mxu1 %v2279_v63  ;;  %748 = vmatpush.bf16.msra.mxu0 %v2207_v39  ;;  %v2244_v63 = vld [vmem:[#allocation8 + $0x188] sm:$0xf0] }
  0xca   :  { %718 = vmatpush.bf16.msrb.mxu2 %v2219_v22  ;;  %v2247_v1 = vor.u32 %v2936_v61, %v2244_v63  ;;  %v2965_v63 = vld [vmem:[#allocation8 + $0x264] sm:$0xf0] }
  0xcc   :  { %736 = vmatpush.bf16.msrb.mxu3 %v2251_v52 }
  0xcd   :  { %762 = vmatpush.bf16.msra.mxu1 %v2271_v30  ;;  %749 = vmatpush.bf16.msra.mxu0 %v2199_v58  ;;  %v2423_v30 = vor.u32 %v2980_v23, %v2420_v24  ;;  %v2978_v58 = vld [vmem:[#allocation8 + $0x2d4] sm:$0xf]  ;;  %v2338_v24 = vld [vmem:[#allocation8 + $0x240] sm:$0xf] }
  0xce   :  { %719 = vmatpush.bf16.msrb.mxu2 %v2211_v34  ;;  %v2415_v61 = vor.u32 %v2978_v58, %v2412_v60  ;;  %v2339_v27 = vor.u32 %v2961_v25, %v2338_v24  ;;  %v2314_v58 = vld [vmem:[#allocation8 + $0x210] sm:$0xf]  ;;  %v2954_v60 = vld [vmem:[#allocation8 + $0x214] sm:$0xf] }
  0xd0   :  { %737 = vmatpush.bf16.msrb.mxu3 %v2243_v62  ;;  %v2354_v62 = vld [vmem:[#allocation8 + $0x260] sm:$0xf] }
  0xd1   :  { %763 = vmatpush.bf16.msra.mxu1 %v2263_v43 }
  0xd2   :  { %720 = vmatpush.bf16.msrb.mxu2 %v2203_v46 }
  0xd5   :  { %764 = vmatpush.bf16.msra.mxu1 %v2255_v54 }
  0xd6   :  { %721 = vmatpush.bf16.msrb.mxu2 %v2195_v2  ;;  %v2410_v2 = vld [vmem:[#allocation8 + $0x2d0] sm:$0xf] }
  0xd7   :  { %v2411_v59 = vor.u32 %v2979_v57, %v2410_v2  ;;  %v2372_v2 = vld [vmem:[#allocation8 + $0x288] sm:$0xf0] }
  0xd9   :  { %765 = vmatpush.bf16.msra.mxu1 %v2247_v1  ;;  %v2964_v1 = vld [vmem:[#allocation8 + $0x264] sm:$0xf] }
 0x134   :  { %v231_v3 = vpop.f32.mrf.mxu0  ;;  %v245_v4 = vpop.f32.mrf.mxu1 }
 0x135   :  { %v232_v7 = vadd.f32 %v231_v3, %v175_v5  ;;  %v246_v8 = vadd.f32 %v245_v4, %v176_v6  ;;  %v2186_v3 = vld [vmem:[#allocation8 + $0x110] sm:$0xf]  ;;  %v2923_v4 = vld [vmem:[#allocation8 + $0x114] sm:$0xf0] }
 0x137   :  { %v250_v13 = vmax.f32 %v232_v7, 0.0  ;;  %v251_v14 = vmax.f32 %v246_v8, 0.0  ;;  %v2188_v7 = vld [vmem:[#allocation8 + $0x118] sm:$0xf0] }
 0x13c   :  { %v233_v9 = vpop.f32.mrf.mxu0  ;;  %v247_v10 = vpop.f32.mrf.mxu1 }
 0x13d   :  { %v234_v11 = vadd.f32 %v233_v9, %v175_v5  ;;  %v248_v12 = vadd.f32 %v247_v10, %v176_v6  ;;  %v2922_v5 = vld [vmem:[#allocation8 + $0x114] sm:$0xf]  ;;  %v2187_v6 = vor.u32 %v2923_v4, %v2186_v3  ;;  %v2178_v9 = vld [vmem:[#allocation8 + $0x100] sm:$0xf]  ;;  %v2921_v10 = vld [vmem:[#allocation8 + $0x104] sm:$0xf0]  ;;  %v2355_v3 = vor.u32 %v2965_v63, %v2354_v62 }
 0x13e   :  { %v2191_v8 = vor.u32 %v2922_v5, %v2188_v7  ;;  %v2356_v4 = vld [vmem:[#allocation8 + $0x268] sm:$0xf0]  ;;  %v2402_v5 = vld [vmem:[#allocation8 + $0x2c0] sm:$0xf]  ;;  %v2316_v62 = vld [vmem:[#allocation8 + $0x218] sm:$0xf0] }
 0x13f   :  { %v252_v15 = vmax.f32 %v234_v11, 0.0  ;;  %v253_v16 = vmax.f32 %v248_v12, 0.0  ;;  %722 = vmatpush.bf16.msrb.mxu2 %v2187_v6  ;;  %v2920_v11 = vld [vmem:[#allocation8 + $0x104] sm:$0xf]  ;;  %v2179_v12 = vor.u32 %v2921_v10, %v2178_v9  ;;  %v2977_v6 = vld [vmem:[#allocation8 + $0x2c4] sm:$0xf0]  ;;  %v2359_v7 = vor.u32 %v2964_v1, %v2356_v4 }
 0x140   :  { %750 = vmatpush.bf16.msra.mxu0 %v2191_v8  ;;  %v2403_v8 = vor.u32 %v2977_v6, %v2402_v5  ;;  %v2976_v9 = vld [vmem:[#allocation8 + $0x2c4] sm:$0xf]  ;;  %v2404_v10 = vld [vmem:[#allocation8 + $0x2c8] sm:$0xf0]  ;;  %v2319_v63 = vor.u32 %v2954_v60, %v2316_v62  ;;  %v2306_v1 = vld [vmem:[#allocation8 + $0x200] sm:$0xf] }
 0x141   :  { %v254_v17 = vpack.c.bf16 %v252_v15, %v250_v13  ;;  %v255_v18 = vpack.c.bf16 %v253_v16, %v251_v14  ;;  %v2180_v13 = vld [vmem:[#allocation8 + $0x108] sm:$0xf0]  ;;  %v2426_v15 = vld [vmem:[#allocation8 + $0x2f0] sm:$0xf]  ;;  %v2983_v16 = vld [vmem:[#allocation8 + $0x2f4] sm:$0xf0] }
 0x142   :  { %v2183_v14 = vor.u32 %v2920_v11, %v2180_v13  ;;  %v2407_v11 = vor.u32 %v2976_v9, %v2404_v10  ;;  %v2963_v13 = vld [vmem:[#allocation8 + $0x254] sm:$0xf0]  ;;  %v2952_v4 = vld [vmem:[#allocation8 + $0x204] sm:$0xf]  ;;  %v2308_v6 = vld [vmem:[#allocation8 + $0x208] sm:$0xf0] }
 0x143   :  { %462 = vmatmul.bf16.vlgmr.msra.gmra.mxu2 %v254_v17  ;;  %476 = vmatmul.bf16.vlgmr.msra.gmra.mxu3 %v255_v18  ;;  %v3015_v9 = vld [vmem:[#allocation8 + $0x3f4] sm:$0xf0]  ;;  %v3014_v10 = vld [vmem:[#allocation8 + $0x3f4] sm:$0xf]  ;;  %v2530_v60 = vld [vmem:[#allocation8 + $0x3c0] sm:$0xf] }
 0x144   :  { %490 = vmatmul.bf16.vlgmr.msrb.gmra.mxu0 %v254_v17  ;;  %504 = vmatmul.bf16.vlgmr.msrb.gmra.mxu1 %v255_v18  ;;  %v2982_v17 = vld [vmem:[#allocation8 + $0x2f4] sm:$0xf]  ;;  %v2427_v18 = vor.u32 %v2983_v16, %v2426_v15  ;;  %v2348_v16 = vld [vmem:[#allocation8 + $0x258] sm:$0xf0] }
 0x145   :  { %723 = vmatpush.bf16.msrb.mxu2 %v2179_v12  ;;  %751 = vmatpush.bf16.msra.mxu0 %v2183_v14  ;;  %v2431_v22 = vor.u32 %v2982_v17, %v2428_v19  ;;  %v2346_v12 = vld [vmem:[#allocation8 + $0x250] sm:$0xf]  ;;  %v2962_v14 = vld [vmem:[#allocation8 + $0x254] sm:$0xf]  ;;  %v2975_v19 = vld [vmem:[#allocation8 + $0x2b4] sm:$0xf0] }
 0x146   :  { %992 = vmatpush.bf16.msra.mxu3 %v2427_v18  ;;  %v2347_v15 = vor.u32 %v2963_v13, %v2346_v12  ;;  %v2351_v17 = vor.u32 %v2962_v14, %v2348_v16  ;;  %v2394_v18 = vld [vmem:[#allocation8 + $0x2b0] sm:$0xf]  ;;  %v2556_v12 = vld [vmem:[#allocation8 + $0x3f8] sm:$0xf0]  ;;  %v2546_v13 = vld [vmem:[#allocation8 + $0x3e0] sm:$0xf] }
 0x147   :  { %1020 = vmatpush.bf16.msrb.mxu1 %v2431_v22  ;;  %v2395_v20 = vor.u32 %v2975_v19, %v2394_v18  ;;  %v2396_v22 = vld [vmem:[#allocation8 + $0x2b8] sm:$0xf0]  ;;  %v3013_v14 = vld [vmem:[#allocation8 + $0x3e4] sm:$0xf0]  ;;  %v3012_v16 = vld [vmem:[#allocation8 + $0x3e4] sm:$0xf] }
 0x148   :  { %v2399_v23 = vor.u32 %v2974_v21, %v2396_v22  ;;  %v2490_v18 = vld [vmem:[#allocation8 + $0x370] sm:$0xf]  ;;  %v2547_v19 = vor.u32 %v3013_v14, %v2546_v13  ;;  %v2998_v21 = vld [vmem:[#allocation8 + $0x374] sm:$0xf]  ;;  %v2492_v22 = vld [vmem:[#allocation8 + $0x378] sm:$0xf0] }
 0x149   :  { %978 = vmatpush.bf16.msra.mxu2 %v2363_v31  ;;  %1006 = vmatpush.bf16.msrb.mxu0 %v2367_v32  ;;  %v2973_v31 = vld [vmem:[#allocation8 + $0x2a4] sm:$0xf0]  ;;  %v2972_v32 = vld [vmem:[#allocation8 + $0x2a4] sm:$0xf]  ;;  %v2495_v25 = vor.u32 %v2998_v21, %v2492_v22  ;;  %v3006_v14 = vld [vmem:[#allocation8 + $0x3b4] sm:$0xf] }
 0x14a   :  { %993 = vmatpush.bf16.msra.mxu3 %v2419_v26  ;;  %v2960_v26 = vld [vmem:[#allocation8 + $0x244] sm:$0xf]  ;;  %v2468_v21 = vld [vmem:[#allocation8 + $0x348] sm:$0xf0] }
 0x14b   :  { %1021 = vmatpush.bf16.msrb.mxu1 %v2423_v30  ;;  %v2343_v29 = vor.u32 %v2960_v26, %v2340_v28  ;;  %v2386_v30 = vld [vmem:[#allocation8 + $0x2a0] sm:$0xf] }
 0x14c   :  { %v2387_v33 = vor.u32 %v2973_v31, %v2386_v30  ;;  %v550_v26 = vld [vmem:[#allocation10 + $0x2] sm:$0x3] }
 0x14d   :  { %979 = vmatpush.bf16.msra.mxu2 %v2355_v3  ;;  %1007 = vmatpush.bf16.msrb.mxu0 %v2359_v7  ;;  %v2953_v3 = vld [vmem:[#allocation8 + $0x204] sm:$0xf0]  ;;  %v2311_v7 = vor.u32 %v2952_v4, %v2308_v6  ;;  %v2995_v6 = vld [vmem:[#allocation8 + $0x354] sm:$0xf0] }
 0x14e   :  { %994 = vmatpush.bf16.msra.mxu3 %v2411_v59  ;;  %v2955_v59 = vld [vmem:[#allocation8 + $0x214] sm:$0xf0]  ;;  %v2307_v5 = vor.u32 %v2953_v3, %v2306_v1  ;;  %v3008_v1 = vld [vmem:[#allocation8 + $0x3c4] sm:$0xf]  ;;  %v2532_v3 = vld [vmem:[#allocation8 + $0x3c8] sm:$0xf0] }
 0x14f   :  { %1022 = vmatpush.bf16.msrb.mxu1 %v2415_v61  ;;  %v2315_v61 = vor.u32 %v2955_v59, %v2314_v58  ;;  %v2484_v59 = vld [vmem:[#allocation8 + $0x368] sm:$0xf0]  ;;  %v2535_v4 = vor.u32 %v3008_v1, %v2532_v3  ;;  %v3047_v1 = vld [vmem:[#allocation8 + $0x4f4] sm:$0xf0]  ;;  %v3046_v3 = vld [vmem:[#allocation8 + $0x4f4] sm:$0xf] }
 0x151   :  { %980 = vmatpush.bf16.msra.mxu2 %v2347_v15  ;;  %1008 = vmatpush.bf16.msrb.mxu0 %v2351_v17  ;;  %v2559_v15 = vor.u32 %v3014_v10, %v2556_v12  ;;  %v2548_v17 = vld [vmem:[#allocation8 + $0x3e8] sm:$0xf0]  ;;  %v3007_v12 = vld [vmem:[#allocation8 + $0x3b4] sm:$0xf0] }
 0x152   :  { %995 = vmatpush.bf16.msra.mxu3 %v2403_v8  ;;  %v2554_v8 = vld [vmem:[#allocation8 + $0x3f0] sm:$0xf] }
 0x153   :  { %1023 = vmatpush.bf16.msrb.mxu1 %v2407_v11  ;;  %v2555_v11 = vor.u32 %v3015_v9, %v2554_v8  ;;  %v2476_v9 = vld [vmem:[#allocation8 + $0x358] sm:$0xf0] }
 0x155   :  { %981 = vmatpush.bf16.msra.mxu2 %v2339_v27  ;;  %1009 = vmatpush.bf16.msrb.mxu0 %v2343_v29  ;;  %v553_v29 = vperm.slane %v550_v26, 1 }
 0x156   :  { %996 = vmatpush.bf16.msra.mxu3 %v2395_v20  ;;  %v2999_v20 = vld [vmem:[#allocation8 + $0x374] sm:$0xf0] }
 0x157   :  { %1024 = vmatpush.bf16.msrb.mxu1 %v2399_v23  ;;  %v2551_v23 = vor.u32 %v3012_v16, %v2548_v17  ;;  %v2491_v24 = vor.u32 %v2999_v20, %v2490_v18  ;;  %v2466_v17 = vld [vmem:[#allocation8 + $0x340] sm:$0xf]  ;;  %v2993_v18 = vld [vmem:[#allocation8 + $0x344] sm:$0xf0] }
 0x158   :  { %v2467_v20 = vor.u32 %v2993_v18, %v2466_v17 }
 0x15a   :  { %997 = vmatpush.bf16.msra.mxu3 %v2387_v33  ;;  %v552_v33 = vperm.slane %v550_v26, 0 }
 0x1c1   :  { %v491_v34 = vpop.f32.mrf.mxu0  ;;  %v505_v35 = vpop.f32.mrf.mxu1 }
 0x1c2   :  { %v492_v37 = vadd.f32 %v491_v34, %v291_v36  ;;  %v2388_v34 = vld [vmem:[#allocation8 + $0x2a8] sm:$0xf0] }
 0x1c4   :  { %v506_v43 = vadd.f32 %v505_v35, %v492_v37  ;;  %v2391_v35 = vor.u32 %v2972_v32, %v2388_v34  ;;  %v2959_v37 = vld [vmem:[#allocation8 + $0x234] sm:$0xf0] }
 0x1c6   :  { %v463_v38 = vpop.f32.mrf.mxu2  ;;  %v477_v40 = vpop.f32.mrf.mxu3  ;;  %v511_v48 = vmax.f32 %v506_v43, 0.0  ;;  %1025 = vmatpush.bf16.msrb.mxu1 %v2391_v35  ;;  %v2378_v43 = vld [vmem:[#allocation8 + $0x290] sm:$0xf] }
 0x1c7   :  { %v464_v45 = vadd.f32 %v463_v38, %v290_v41  ;;  %v2958_v38 = vld [vmem:[#allocation8 + $0x234] sm:$0xf] }
 0x1c9   :  { %v493_v42 = vpop.f32.mrf.mxu0  ;;  %v507_v46 = vpop.f32.mrf.mxu1  ;;  %v478_v50 = vadd.f32 %v477_v40, %v464_v45  ;;  %v2970_v45 = vld [vmem:[#allocation8 + $0x294] sm:$0xf] }
 0x1ca   :  { %v494_v44 = vadd.f32 %v493_v42, %v291_v36  ;;  %v2330_v36 = vld [vmem:[#allocation8 + $0x230] sm:$0xf] }
 0x1cb   :  { %v510_v55 = vmax.f32 %v478_v50, 0.0  ;;  %v2331_v40 = vor.u32 %v2959_v37, %v2330_v36  ;;  %v2956_v50 = vld [vmem:[#allocation8 + $0x224] sm:$0xf] }
 0x1cc   :  { %v508_v47 = vadd.f32 %v507_v46, %v494_v44  ;;  %v2971_v44 = vld [vmem:[#allocation8 + $0x294] sm:$0xf0] }
 0x1cd   :  { %982 = vmatpush.bf16.msra.mxu2 %v2331_v40  ;;  %v2379_v46 = vor.u32 %v2971_v44, %v2378_v43 }
 0x1ce   :  { %v513_v39 = vmax.f32 %v508_v47, 0.0  ;;  %v465_v49 = vpop.f32.mrf.mxu2  ;;  %v479_v53 = vpop.f32.mrf.mxu3  ;;  %v2380_v47 = vld [vmem:[#allocation8 + $0x298] sm:$0xf0] }
 0x1cf   :  { %v466_v51 = vadd.f32 %v465_v49, %v290_v41  ;;  %v2332_v41 = vld [vmem:[#allocation8 + $0x238] sm:$0xf0]  ;;  %v2957_v49 = vld [vmem:[#allocation8 + $0x224] sm:$0xf0]  ;;  %998 = vmatpush.bf16.msra.mxu3 %v2379_v46 }
 0x1d0   :  { %v515_v52 = vpack.c.bf16 %v513_v39, %v511_v48  ;;  %v2335_v42 = vor.u32 %v2958_v38, %v2332_v41  ;;  %v2383_v48 = vor.u32 %v2970_v45, %v2380_v47  ;;  %v2322_v39 = vld [vmem:[#allocation8 + $0x220] sm:$0xf] }
 0x1d1   :  { %v480_v54 = vadd.f32 %v479_v53, %v466_v51  ;;  %v2323_v51 = vor.u32 %v2957_v49, %v2322_v39 }
 0x1d2   :  { %738 = vmatmul.bf16.vlgmr.msrb.gmra.mxu3 %v515_v52  ;;  %766 = vmatmul.bf16.vlgmr.msra.gmra.mxu1 %v515_v52  ;;  %v2324_v52 = vld [vmem:[#allocation8 + $0x228] sm:$0xf0] }
 0x1d3   :  { %v512_v56 = vmax.f32 %v480_v54, 0.0  ;;  %1010 = vmatpush.bf16.msrb.mxu0 %v2335_v42  ;;  %1026 = vmatpush.bf16.msrb.mxu1 %v2383_v48  ;;  %v2327_v53 = vor.u32 %v2956_v50, %v2324_v52  ;;  %v2370_v54 = vld [vmem:[#allocation8 + $0x280] sm:$0xf]  ;;  %v3011_v52 = vld [vmem:[#allocation8 + $0x3d4] sm:$0xf0] }
 0x1d4   :  { %983 = vmatpush.bf16.msra.mxu2 %v2323_v51  ;;  %v2538_v51 = vld [vmem:[#allocation8 + $0x3d0] sm:$0xf] }
 0x1d5   :  { %v514_v0 = vpack.c.bf16 %v512_v56, %v510_v55  ;;  %v2969_v55 = vld [vmem:[#allocation8 + $0x284] sm:$0xf0]  ;;  %v2968_v56 = vld [vmem:[#allocation8 + $0x284] sm:$0xf] }
 0x1d6   :  { %v2375_v57 = vor.u32 %v2968_v56, %v2372_v2  ;;  %v2997_v2 = vld [vmem:[#allocation8 + $0x364] sm:$0xf0] }
 0x1d7   :  { %724 = vmatmul.bf16.vlgmr.msrb.gmra.mxu2 %v514_v0  ;;  %752 = vmatmul.bf16.vlgmr.msra.gmra.mxu0 %v514_v0  ;;  %v2371_v0 = vor.u32 %v2969_v55, %v2370_v54  ;;  %v2539_v54 = vor.u32 %v3011_v52, %v2538_v51  ;;  %v2540_v55 = vld [vmem:[#allocation8 + $0x3d8] sm:$0xf0]  ;;  %v2500_v51 = vld [vmem:[#allocation8 + $0x388] sm:$0xf0] }
 0x1d8   :  { %1011 = vmatpush.bf16.msrb.mxu0 %v2327_v53  ;;  %1027 = vmatpush.bf16.msrb.mxu1 %v2375_v57  ;;  %v3010_v53 = vld [vmem:[#allocation8 + $0x3d4] sm:$0xf]  ;;  %v2996_v57 = vld [vmem:[#allocation8 + $0x364] sm:$0xf] }
 0x1d9   :  { %999 = vmatpush.bf16.msra.mxu3 %v2371_v0  ;;  %984 = vmatpush.bf16.msra.mxu2 %v2315_v61  ;;  %v2543_v56 = vor.u32 %v3010_v53, %v2540_v55  ;;  %v2482_v0 = vld [vmem:[#allocation8 + $0x360] sm:$0xf]  ;;  %v3009_v61 = vld [vmem:[#allocation8 + $0x3c4] sm:$0xf0]  ;;  %v2487_v62 = vor.u32 %v2996_v57, %v2484_v59  ;;  %v2442_v53 = vld [vmem:[#allocation8 + $0x310] sm:$0xf] }
 0x1da   :  { %v2483_v58 = vor.u32 %v2997_v2, %v2482_v0  ;;  %v2986_v55 = vld [vmem:[#allocation8 + $0x314] sm:$0xf]  ;;  %v2444_v0 = vld [vmem:[#allocation8 + $0x318] sm:$0xf0]  ;;  %v2434_v57 = vld [vmem:[#allocation8 + $0x300] sm:$0xf] }
 0x1db   :  { %v2447_v2 = vor.u32 %v2986_v55, %v2444_v0  ;;  %v2984_v59 = vld [vmem:[#allocation8 + $0x304] sm:$0xf]  ;;  %v2658_v55 = vld [vmem:[#allocation8 + $0x4c0] sm:$0xf] }
 0x1dc   :  { %1012 = vmatpush.bf16.msrb.mxu0 %v2319_v63  ;;  %1282 = vmatpush.bf16.msra.mxu1 %v2559_v15  ;;  %v2531_v63 = vor.u32 %v3009_v61, %v2530_v60  ;;  %v2524_v15 = vld [vmem:[#allocation8 + $0x3b8] sm:$0xf0]  ;;  %v2436_v61 = vld [vmem:[#allocation8 + $0x308] sm:$0xf0] }
 0x1dd   :  { %985 = vmatpush.bf16.msra.mxu2 %v2307_v5  ;;  %1254 = vmatpush.bf16.msrb.mxu3 %v2555_v11  ;;  %v2474_v5 = vld [vmem:[#allocation8 + $0x350] sm:$0xf]  ;;  %v2527_v16 = vor.u32 %v3006_v14, %v2524_v15  ;;  %v3030_v14 = vld [vmem:[#allocation8 + $0x474] sm:$0xf]  ;;  %v2620_v15 = vld [vmem:[#allocation8 + $0x478] sm:$0xf0] }
 0x1de   :  { %v2475_v8 = vor.u32 %v2995_v6, %v2474_v5  ;;  %v2522_v11 = vld [vmem:[#allocation8 + $0x3b0] sm:$0xf]  ;;  %v2684_v5 = vld [vmem:[#allocation8 + $0x4f8] sm:$0xf0]  ;;  %v2674_v6 = vld [vmem:[#allocation8 + $0x4e0] sm:$0xf]  ;;  %v2623_v18 = vor.u32 %v3030_v14, %v2620_v15 }
 0x1df   :  { %v2523_v13 = vor.u32 %v3007_v12, %v2522_v11  ;;  %v2618_v11 = vld [vmem:[#allocation8 + $0x470] sm:$0xf]  ;;  %v2596_v14 = vld [vmem:[#allocation8 + $0x448] sm:$0xf0] }
 0x1e0   :  { %1013 = vmatpush.bf16.msrb.mxu0 %v2311_v7  ;;  %1283 = vmatpush.bf16.msra.mxu1 %v2551_v23  ;;  %v2994_v7 = vld [vmem:[#allocation8 + $0x354] sm:$0xf]  ;;  %v2514_v23 = vld [vmem:[#allocation8 + $0x3a0] sm:$0xf] }
 0x1e1   :  { %1240 = vmatpush.bf16.msrb.mxu2 %v2491_v24  ;;  %1255 = vmatpush.bf16.msrb.mxu3 %v2547_v19  ;;  %v2479_v10 = vor.u32 %v2994_v7, %v2476_v9  ;;  %v2992_v19 = vld [vmem:[#allocation8 + $0x344] sm:$0xf]  ;;  %v3005_v24 = vld [vmem:[#allocation8 + $0x3a4] sm:$0xf0] }
 0x1e2   :  { %v2471_v22 = vor.u32 %v2992_v19, %v2468_v21  ;;  %v2515_v26 = vor.u32 %v3005_v24, %v2514_v23  ;;  %v3045_v7 = vld [vmem:[#allocation8 + $0x4e4] sm:$0xf0]  ;;  %v3044_v9 = vld [vmem:[#allocation8 + $0x4e4] sm:$0xf] }
 0x1e3   :  { %v2675_v12 = vor.u32 %v3045_v7, %v2674_v6  ;;  %v812_v19 = vld [vmem:[#allocation10 + $0x4] sm:$0x3]  ;;  %v3038_v7 = vld [vmem:[#allocation8 + $0x4b4] sm:$0xf] }
 0x1e4   :  { %1268 = vmatpush.bf16.msra.mxu0 %v2495_v25  ;;  %1284 = vmatpush.bf16.msra.mxu1 %v2543_v56  ;;  %v3004_v25 = vld [vmem:[#allocation8 + $0x3a4] sm:$0xf] }
 0x1e5   :  { %1256 = vmatpush.bf16.msrb.mxu3 %v2539_v54  ;;  %1241 = vmatpush.bf16.msrb.mxu2 %v2483_v58  ;;  %v2987_v54 = vld [vmem:[#allocation8 + $0x314] sm:$0xf0]  ;;  %v2985_v58 = vld [vmem:[#allocation8 + $0x304] sm:$0xf0] }
 0x1e6   :  { %v2443_v56 = vor.u32 %v2987_v54, %v2442_v53  ;;  %v2435_v60 = vor.u32 %v2985_v58, %v2434_v57  ;;  %v2612_v54 = vld [vmem:[#allocation8 + $0x468] sm:$0xf0]  ;;  %v3040_v57 = vld [vmem:[#allocation8 + $0x4c4] sm:$0xf] }
 0x1e7   :  { %v2660_v58 = vld [vmem:[#allocation8 + $0x4c8] sm:$0xf0] }
 0x1e8   :  { %1269 = vmatpush.bf16.msra.mxu0 %v2487_v62  ;;  %1285 = vmatpush.bf16.msra.mxu1 %v2535_v4  ;;  %v2439_v62 = vor.u32 %v2984_v59, %v2436_v61  ;;  %v2663_v59 = vor.u32 %v3040_v57, %v2660_v58  ;;  %v3027_v61 = vld [vmem:[#allocation8 + $0x454] sm:$0xf0]  ;;  %v3078_v58 = vld [vmem:[#allocation8 + $0x5f4] sm:$0xf] }
 0x1e9   :  { %1257 = vmatpush.bf16.msrb.mxu3 %v2531_v63  ;;  %1242 = vmatpush.bf16.msrb.mxu2 %v2475_v8  ;;  %v2682_v63 = vld [vmem:[#allocation8 + $0x4f0] sm:$0xf]  ;;  %v2687_v8 = vor.u32 %v3046_v3, %v2684_v5  ;;  %v3039_v5 = vld [vmem:[#allocation8 + $0x4b4] sm:$0xf0] }
 0x1ea   :  { %v2683_v4 = vor.u32 %v3047_v1, %v2682_v63  ;;  %v2604_v1 = vld [vmem:[#allocation8 + $0x458] sm:$0xf0]  ;;  %v3079_v57 = vld [vmem:[#allocation8 + $0x5f4] sm:$0xf0] }
 0x1ec   :  { %1270 = vmatpush.bf16.msra.mxu0 %v2479_v10  ;;  %1286 = vmatpush.bf16.msra.mxu1 %v2527_v16  ;;  %v2676_v10 = vld [vmem:[#allocation8 + $0x4e8] sm:$0xf0] }
 0x1ed   :  { %1258 = vmatpush.bf16.msrb.mxu3 %v2523_v13  ;;  %1243 = vmatpush.bf16.msrb.mxu2 %v2467_v20  ;;  %v3031_v13 = vld [vmem:[#allocation8 + $0x474] sm:$0xf0]  ;;  %v2679_v16 = vor.u32 %v3044_v9, %v2676_v10  ;;  %v2594_v10 = vld [vmem:[#allocation8 + $0x440] sm:$0xf] }
 0x1ee   :  { %v2619_v17 = vor.u32 %v3031_v13, %v2618_v11  ;;  %v3025_v11 = vld [vmem:[#allocation8 + $0x444] sm:$0xf0] }
 0x1ef   :  { %v2595_v13 = vor.u32 %v3025_v11, %v2594_v10 }
 0x1f0   :  { %1271 = vmatpush.bf16.msra.mxu0 %v2471_v22  ;;  %v815_v22 = vperm.slane %v812_v19, 1 }
 0x1f1   :  { %1259 = vmatpush.bf16.msrb.mxu3 %v2515_v26  ;;  %v814_v26 = vperm.slane %v812_v19, 0 }
 0x24f   :  { %v767_v27 = vpop.f32.mrf.mxu1 }
 0x254   :  { %v753_v28 = vpop.f32.mrf.mxu0 }
 0x255   :  { %v754_v30 = vadd.f32 %v753_v28, %v553_v29  ;;  %v739_v31 = vpop.f32.mrf.mxu3 }
 0x257   :  { %v768_v35 = vadd.f32 %v767_v27, %v754_v30  ;;  %v769_v37 = vpop.f32.mrf.mxu1  ;;  %v2516_v27 = vld [vmem:[#allocation8 + $0x3a8] sm:$0xf0]  ;;  %v2991_v30 = vld [vmem:[#allocation8 + $0x334] sm:$0xf0] }
 0x258   :  { %v2519_v28 = vor.u32 %v3004_v25, %v2516_v27 }
 0x259   :  { %v773_v41 = vmax.f32 %v768_v35, 0.0  ;;  %v2506_v35 = vld [vmem:[#allocation8 + $0x390] sm:$0xf] }
 0x25a   :  { %v725_v32 = vpop.f32.mrf.mxu2  ;;  %1287 = vmatpush.bf16.msra.mxu1 %v2519_v28 }
 0x25b   :  { %v726_v38 = vadd.f32 %v725_v32, %v552_v33 }
 0x25c   :  { %v755_v34 = vpop.f32.mrf.mxu0 }
 0x25d   :  { %v756_v36 = vadd.f32 %v755_v34, %v553_v29  ;;  %v740_v44 = vadd.f32 %v739_v31, %v726_v38  ;;  %v741_v47 = vpop.f32.mrf.mxu3  ;;  %v2458_v29 = vld [vmem:[#allocation8 + $0x330] sm:$0xf]  ;;  %v2990_v31 = vld [vmem:[#allocation8 + $0x334] sm:$0xf] }
 0x25e   :  { %v2459_v32 = vor.u32 %v2991_v30, %v2458_v29 }
 0x25f   :  { %v770_v40 = vadd.f32 %v769_v37, %v756_v36  ;;  %v772_v39 = vmax.f32 %v740_v44, 0.0  ;;  %v3003_v36 = vld [vmem:[#allocation8 + $0x394] sm:$0xf0]  ;;  %v3002_v37 = vld [vmem:[#allocation8 + $0x394] sm:$0xf] }
 0x260   :  { %1244 = vmatpush.bf16.msrb.mxu2 %v2459_v32  ;;  %v2507_v38 = vor.u32 %v3003_v36, %v2506_v35  ;;  %v2988_v44 = vld [vmem:[#allocation8 + $0x324] sm:$0xf] }
 0x261   :  { %v775_v42 = vmax.f32 %v770_v40, 0.0  ;;  %v2508_v40 = vld [vmem:[#allocation8 + $0x398] sm:$0xf0] }
 0x262   :  { %v727_v43 = vpop.f32.mrf.mxu2  ;;  %1260 = vmatpush.bf16.msrb.mxu3 %v2507_v38 }
 0x263   :  { %v777_v45 = vpack.c.bf16 %v775_v42, %v773_v41  ;;  %v728_v46 = vadd.f32 %v727_v43, %v552_v33  ;;  %v2460_v33 = vld [vmem:[#allocation8 + $0x338] sm:$0xf0]  ;;  %v2511_v41 = vor.u32 %v3002_v37, %v2508_v40  ;;  %v2450_v42 = vld [vmem:[#allocation8 + $0x320] sm:$0xf]  ;;  %v2989_v43 = vld [vmem:[#allocation8 + $0x324] sm:$0xf0] }
 0x264   :  { %v2463_v34 = vor.u32 %v2990_v31, %v2460_v33 }
 0x265   :  { %v742_v48 = vadd.f32 %v741_v47, %v728_v46  ;;  %1000 = vmatmul.bf16.vlgmr.msra.gmra.mxu3 %v777_v45  ;;  %1028 = vmatmul.bf16.vlgmr.msrb.gmra.mxu1 %v777_v45  ;;  %v2451_v45 = vor.u32 %v2989_v43, %v2450_v42  ;;  %v2452_v46 = vld [vmem:[#allocation8 + $0x328] sm:$0xf0] }
 0x266   :  { %1272 = vmatpush.bf16.msra.mxu0 %v2463_v34  ;;  %1288 = vmatpush.bf16.msra.mxu1 %v2511_v41  ;;  %v2455_v47 = vor.u32 %v2988_v44, %v2452_v46  ;;  %v3043_v46 = vld [vmem:[#allocation8 + $0x4d4] sm:$0xf0] }
 0x267   :  { %v774_v49 = vmax.f32 %v742_v48, 0.0  ;;  %v2498_v48 = vld [vmem:[#allocation8 + $0x380] sm:$0xf]  ;;  %1245 = vmatpush.bf16.msrb.mxu2 %v2451_v45  ;;  %v2666_v45 = vld [vmem:[#allocation8 + $0x4d0] sm:$0xf] }
 0x269   :  { %v776_v50 = vpack.c.bf16 %v774_v49, %v772_v39  ;;  %v3001_v39 = vld [vmem:[#allocation8 + $0x384] sm:$0xf0]  ;;  %v3000_v49 = vld [vmem:[#allocation8 + $0x384] sm:$0xf] }
 0x26a   :  { %1273 = vmatpush.bf16.msra.mxu0 %v2455_v47  ;;  %v2503_v52 = vor.u32 %v3000_v49, %v2500_v51  ;;  %v3042_v47 = vld [vmem:[#allocation8 + $0x4d4] sm:$0xf]  ;;  %v3029_v51 = vld [vmem:[#allocation8 + $0x464] sm:$0xf0] }
 0x26b   :  { %986 = vmatmul.bf16.vlgmr.msra.gmra.mxu2 %v776_v50  ;;  %1014 = vmatmul.bf16.vlgmr.msrb.gmra.mxu0 %v776_v50  ;;  %v2499_v50 = vor.u32 %v3001_v39, %v2498_v48  ;;  %v2667_v48 = vor.u32 %v3043_v46, %v2666_v45  ;;  %v2668_v39 = vld [vmem:[#allocation8 + $0x4d8] sm:$0xf0]  ;;  %v2628_v45 = vld [vmem:[#allocation8 + $0x488] sm:$0xf0] }
 0x26c   :  { %1289 = vmatpush.bf16.msra.mxu1 %v2503_v52  ;;  %1246 = vmatpush.bf16.msrb.mxu2 %v2443_v56  ;;  %v2671_v49 = vor.u32 %v3042_v47, %v2668_v39  ;;  %v3028_v52 = vld [vmem:[#allocation8 + $0x464] sm:$0xf]  ;;  %v3041_v56 = vld [vmem:[#allocation8 + $0x4c4] sm:$0xf0]  ;;  %v2570_v47 = vld [vmem:[#allocation8 + $0x410] sm:$0xf] }
 0x26d   :  { %1261 = vmatpush.bf16.msrb.mxu3 %v2499_v50  ;;  %v2610_v50 = vld [vmem:[#allocation8 + $0x460] sm:$0xf]  ;;  %v2615_v0 = vor.u32 %v3028_v52, %v2612_v54  ;;  %v3018_v39 = vld [vmem:[#allocation8 + $0x414] sm:$0xf]  ;;  %v3016_v54 = vld [vmem:[#allocation8 + $0x404] sm:$0xf] }
 0x26e   :  { %1274 = vmatpush.bf16.msra.mxu0 %v2447_v2  ;;  %v2611_v53 = vor.u32 %v3029_v51, %v2610_v50  ;;  %v2659_v2 = vor.u32 %v3041_v56, %v2658_v55  ;;  %v2572_v50 = vld [vmem:[#allocation8 + $0x418] sm:$0xf0]  ;;  %v2562_v52 = vld [vmem:[#allocation8 + $0x400] sm:$0xf]  ;;  %v2564_v56 = vld [vmem:[#allocation8 + $0x408] sm:$0xf0] }
 0x26f   :  { %v2575_v51 = vor.u32 %v3018_v39, %v2572_v50  ;;  %v2786_v39 = vld [vmem:[#allocation8 + $0x5c0] sm:$0xf] }
 0x270   :  { %1247 = vmatpush.bf16.msrb.mxu2 %v2435_v60  ;;  %1544 = vmatpush.bf16.msrb.mxu1 %v2687_v8  ;;  %v2602_v60 = vld [vmem:[#allocation8 + $0x450] sm:$0xf]  ;;  %v2652_v8 = vld [vmem:[#allocation8 + $0x4b8] sm:$0xf0] }
 0x271   :  { %1516 = vmatpush.bf16.msra.mxu3 %v2683_v4  ;;  %v2603_v63 = vor.u32 %v3027_v61, %v2602_v60  ;;  %v2650_v4 = vld [vmem:[#allocation8 + $0x4b0] sm:$0xf]  ;;  %v2655_v9 = vor.u32 %v3038_v7, %v2652_v8  ;;  %v2812_v60 = vld [vmem:[#allocation8 + $0x5f8] sm:$0xf0]  ;;  %v2802_v61 = vld [vmem:[#allocation8 + $0x5e0] sm:$0xf] }
 0x272   :  { %1275 = vmatpush.bf16.msra.mxu0 %v2439_v62  ;;  %v3026_v62 = vld [vmem:[#allocation8 + $0x454] sm:$0xf]  ;;  %v2651_v6 = vor.u32 %v3039_v5, %v2650_v4  ;;  %v2746_v4 = vld [vmem:[#allocation8 + $0x570] sm:$0xf]  ;;  %v2748_v8 = vld [vmem:[#allocation8 + $0x578] sm:$0xf0] }
 0x273   :  { %v2607_v3 = vor.u32 %v3026_v62, %v2604_v1  ;;  %v3077_v62 = vld [vmem:[#allocation8 + $0x5e4] sm:$0xf0]  ;;  %v3076_v1 = vld [vmem:[#allocation8 + $0x5e4] sm:$0xf]  ;;  %v3062_v7 = vld [vmem:[#allocation8 + $0x574] sm:$0xf] }
 0x274   :  { %1502 = vmatpush.bf16.msra.mxu2 %v2619_v17  ;;  %1545 = vmatpush.bf16.msrb.mxu1 %v2679_v16  ;;  %v2642_v16 = vld [vmem:[#allocation8 + $0x4a0] sm:$0xf]  ;;  %v3037_v17 = vld [vmem:[#allocation8 + $0x4a4] sm:$0xf0]  ;;  %v2803_v5 = vor.u32 %v3077_v62, %v2802_v61  ;;  %v2751_v11 = vor.u32 %v3062_v7, %v2748_v8  ;;  %v3070_v62 = vld [vmem:[#allocation8 + $0x5b4] sm:$0xf] }
 0x275   :  { %1517 = vmatpush.bf16.msra.mxu3 %v2675_v12  ;;  %v3024_v12 = vld [vmem:[#allocation8 + $0x444] sm:$0xf]  ;;  %v2643_v19 = vor.u32 %v3037_v17, %v2642_v16  ;;  %v2724_v7 = vld [vmem:[#allocation8 + $0x548] sm:$0xf0] }
 0x276   :  { %1530 = vmatpush.bf16.msrb.mxu0 %v2623_v18  ;;  %v2599_v15 = vor.u32 %v3024_v12, %v2596_v14  ;;  %v3036_v18 = vld [vmem:[#allocation8 + $0x4a4] sm:$0xf] }
 0x277   :  { %v1074_v12 = vld [vmem:[#allocation10 + $0x6] sm:$0x3] }
 0x278   :  { %1546 = vmatpush.bf16.msrb.mxu1 %v2671_v49  ;;  %1503 = vmatpush.bf16.msra.mxu2 %v2611_v53  ;;  %v3017_v53 = vld [vmem:[#allocation8 + $0x404] sm:$0xf0] }
 0x279   :  { %1518 = vmatpush.bf16.msra.mxu3 %v2667_v48  ;;  %v3019_v48 = vld [vmem:[#allocation8 + $0x414] sm:$0xf0]  ;;  %v2563_v55 = vor.u32 %v3017_v53, %v2562_v52  ;;  %v3072_v52 = vld [vmem:[#allocation8 + $0x5c4] sm:$0xf]  ;;  %v2788_v53 = vld [vmem:[#allocation8 + $0x5c8] sm:$0xf0] }
 0x27a   :  { %1531 = vmatpush.bf16.msrb.mxu0 %v2615_v0  ;;  %v2571_v49 = vor.u32 %v3019_v48, %v2570_v47  ;;  %v2567_v0 = vor.u32 %v3016_v54, %v2564_v56  ;;  %v2740_v48 = vld [vmem:[#allocation8 + $0x568] sm:$0xf0]  ;;  %v2791_v54 = vor.u32 %v3072_v52, %v2788_v53  ;;  %v3059_v56 = vld [vmem:[#allocation8 + $0x554] sm:$0xf0]  ;;  %v3087_v52 = vld [vmem:[#allocation11 + $0x38] sm:$0xff] }
 0x27b   :  { %v3094_v53 = vld [vmem:[#allocation11 + $0x70] sm:$0xff] }
 0x27c   :  { %1547 = vmatpush.bf16.msrb.mxu1 %v2663_v59  ;;  %1504 = vmatpush.bf16.msra.mxu2 %v2603_v63  ;;  %v2815_v63 = vor.u32 %v3078_v58, %v2812_v60  ;;  %v3071_v60 = vld [vmem:[#allocation8 + $0x5b4] sm:$0xf0] }
 0x27d   :  { %1519 = vmatpush.bf16.msra.mxu3 %v2659_v2  ;;  %v2810_v2 = vld [vmem:[#allocation8 + $0x5f0] sm:$0xf] }
 0x27e   :  { %1532 = vmatpush.bf16.msrb.mxu0 %v2607_v3  ;;  %v2811_v59 = vor.u32 %v3079_v57, %v2810_v2  ;;  %v2804_v3 = vld [vmem:[#allocation8 + $0x5e8] sm:$0xf0]  ;;  %v2732_v57 = vld [vmem:[#allocation8 + $0x558] sm:$0xf0] }
 0x280   :  { %1548 = vmatpush.bf16.msrb.mxu1 %v2655_v9  ;;  %1505 = vmatpush.bf16.msra.mxu2 %v2595_v13  ;;  %v2807_v9 = vor.u32 %v3076_v1, %v2804_v3  ;;  %v2722_v3 = vld [vmem:[#allocation8 + $0x540] sm:$0xf] }
 0x281   :  { %1520 = vmatpush.bf16.msra.mxu3 %v2651_v6  ;;  %v3063_v6 = vld [vmem:[#allocation8 + $0x574] sm:$0xf0] }
 0x282   :  { %1533 = vmatpush.bf16.msrb.mxu0 %v2599_v15  ;;  %v2747_v10 = vor.u32 %v3063_v6, %v2746_v4  ;;  %v1077_v15 = vperm.slane %v1074_v12, 1  ;;  %v3057_v4 = vld [vmem:[#allocation8 + $0x544] sm:$0xf0] }
 0x283   :  { %v2723_v6 = vor.u32 %v3057_v4, %v2722_v3 }
 0x285   :  { %1521 = vmatpush.bf16.msra.mxu3 %v2643_v19  ;;  %v1076_v19 = vperm.slane %v1074_v12, 0 }
 0x2e2   :  { %v1029_v20 = vpop.f32.mrf.mxu1 }
 0x2e8   :  { %v1015_v21 = vpop.f32.mrf.mxu0  ;;  %v1001_v24 = vpop.f32.mrf.mxu3 }
 0x2e9   :  { %v1016_v23 = vadd.f32 %v1015_v21, %v815_v22 }
 0x2ea   :  { %v1031_v30 = vpop.f32.mrf.mxu1 }
 0x2eb   :  { %v1030_v28 = vadd.f32 %v1029_v20, %v1016_v23  ;;  %v2644_v20 = vld [vmem:[#allocation8 + $0x4a8] sm:$0xf0]  ;;  %v3023_v23 = vld [vmem:[#allocation8 + $0x434] sm:$0xf0] }
 0x2ec   :  { %v2647_v21 = vor.u32 %v3036_v18, %v2644_v20 }
 0x2ed   :  { %v1035_v33 = vmax.f32 %v1030_v28, 0.0  ;;  %v2634_v28 = vld [vmem:[#allocation8 + $0x490] sm:$0xf] }
 0x2ee   :  { %v987_v25 = vpop.f32.mrf.mxu2  ;;  %1549 = vmatpush.bf16.msrb.mxu1 %v2647_v21 }
 0x2ef   :  { %v988_v31 = vadd.f32 %v987_v25, %v814_v26 }
 0x2f0   :  { %v1017_v27 = vpop.f32.mrf.mxu0  ;;  %v1003_v40 = vpop.f32.mrf.mxu3 }
 0x2f1   :  { %v1018_v29 = vadd.f32 %v1017_v27, %v815_v22  ;;  %v1002_v36 = vadd.f32 %v1001_v24, %v988_v31  ;;  %v2586_v22 = vld [vmem:[#allocation8 + $0x430] sm:$0xf]  ;;  %v3022_v24 = vld [vmem:[#allocation8 + $0x434] sm:$0xf] }
 0x2f2   :  { %v2587_v25 = vor.u32 %v3023_v23, %v2586_v22 }
 0x2f3   :  { %v1032_v32 = vadd.f32 %v1031_v30, %v1018_v29  ;;  %v1034_v42 = vmax.f32 %v1002_v36, 0.0  ;;  %v3035_v29 = vld [vmem:[#allocation8 + $0x494] sm:$0xf0]  ;;  %v3034_v30 = vld [vmem:[#allocation8 + $0x494] sm:$0xf] }
 0x2f4   :  { %1506 = vmatpush.bf16.msra.mxu2 %v2587_v25  ;;  %v2635_v31 = vor.u32 %v3035_v29, %v2634_v28  ;;  %v3020_v36 = vld [vmem:[#allocation8 + $0x424] sm:$0xf] }
 0x2f5   :  { %v1037_v34 = vmax.f32 %v1032_v32, 0.0  ;;  %v2636_v32 = vld [vmem:[#allocation8 + $0x498] sm:$0xf0] }
 0x2f6   :  { %v989_v35 = vpop.f32.mrf.mxu2  ;;  %1522 = vmatpush.bf16.msra.mxu3 %v2635_v31 }
 0x2f7   :  { %v1039_v37 = vpack.c.bf16 %v1037_v34, %v1035_v33  ;;  %v990_v38 = vadd.f32 %v989_v35, %v814_v26  ;;  %v2588_v26 = vld [vmem:[#allocation8 + $0x438] sm:$0xf0]  ;;  %v2639_v33 = vor.u32 %v3034_v30, %v2636_v32  ;;  %v2578_v34 = vld [vmem:[#allocation8 + $0x420] sm:$0xf]  ;;  %v3021_v35 = vld [vmem:[#allocation8 + $0x424] sm:$0xf0] }
 0x2f8   :  { %v2591_v27 = vor.u32 %v3022_v24, %v2588_v26 }
 0x2f9   :  { %v1004_v41 = vadd.f32 %v1003_v40, %v990_v38  ;;  %1262 = vmatmul.bf16.vlgmr.msrb.gmra.mxu3 %v1039_v37  ;;  %1290 = vmatmul.bf16.vlgmr.msra.gmra.mxu1 %v1039_v37  ;;  %v2579_v37 = vor.u32 %v3021_v35, %v2578_v34  ;;  %v2580_v38 = vld [vmem:[#allocation8 + $0x428] sm:$0xf0] }
 0x2fa   :  { %1534 = vmatpush.bf16.msrb.mxu0 %v2591_v27  ;;  %1550 = vmatpush.bf16.msrb.mxu1 %v2639_v33  ;;  %v2583_v40 = vor.u32 %v3020_v36, %v2580_v38  ;;  %v3075_v38 = vld [vmem:[#allocation8 + $0x5d4] sm:$0xf0] }
 0x2fb   :  { %v1036_v43 = vmax.f32 %v1004_v41, 0.0  ;;  %v2626_v41 = vld [vmem:[#allocation8 + $0x480] sm:$0xf]  ;;  %1507 = vmatpush.bf16.msra.mxu2 %v2579_v37  ;;  %v2794_v37 = vld [vmem:[#allocation8 + $0x5d0] sm:$0xf] }
 0x2fd   :  { %v1038_v44 = vpack.c.bf16 %v1036_v43, %v1034_v42  ;;  %v3033_v42 = vld [vmem:[#allocation8 + $0x484] sm:$0xf0]  ;;  %v3032_v43 = vld [vmem:[#allocation8 + $0x484] sm:$0xf] }
 0x2fe   :  { %1535 = vmatpush.bf16.msrb.mxu0 %v2583_v40  ;;  %v2631_v46 = vor.u32 %v3032_v43, %v2628_v45  ;;  %v3074_v40 = vld [vmem:[#allocation8 + $0x5d4] sm:$0xf]  ;;  %v3061_v45 = vld [vmem:[#allocation8 + $0x564] sm:$0xf0] }
 0x2ff   :  { %1248 = vmatmul.bf16.vlgmr.msrb.gmra.mxu2 %v1038_v44  ;;  %1276 = vmatmul.bf16.vlgmr.msra.gmra.mxu0 %v1038_v44  ;;  %v2627_v44 = vor.u32 %v3033_v42, %v2626_v41  ;;  %v2795_v41 = vor.u32 %v3075_v38, %v2794_v37  ;;  %v2796_v42 = vld [vmem:[#allocation8 + $0x5d8] sm:$0xf0]  ;;  %v2756_v37 = vld [vmem:[#allocation8 + $0x588] sm:$0xf0] }
 0x300   :  { %1551 = vmatpush.bf16.msrb.mxu1 %v2631_v46  ;;  %1508 = vmatpush.bf16.msra.mxu2 %v2571_v49  ;;  %v2799_v43 = vor.u32 %v3074_v40, %v2796_v42  ;;  %v3060_v46 = vld [vmem:[#allocation8 + $0x564] sm:$0xf]  ;;  %v3073_v49 = vld [vmem:[#allocation8 + $0x5c4] sm:$0xf0]  ;;  %v2698_v40 = vld [vmem:[#allocation8 + $0x510] sm:$0xf] }
 0x301   :  { %1523 = vmatpush.bf16.msra.mxu3 %v2627_v44  ;;  %v2738_v44 = vld [vmem:[#allocation8 + $0x560] sm:$0xf]  ;;  %v2743_v50 = vor.u32 %v3060_v46, %v2740_v48  ;;  %v3050_v42 = vld [vmem:[#allocation8 + $0x514] sm:$0xf]  ;;  %v3048_v48 = vld [vmem:[#allocation8 + $0x504] sm:$0xf] }
 0x302   :  { %1536 = vmatpush.bf16.msrb.mxu0 %v2575_v51  ;;  %v2739_v47 = vor.u32 %v3061_v45, %v2738_v44  ;;  %v2787_v51 = vor.u32 %v3073_v49, %v2786_v39  ;;  %v2700_v44 = vld [vmem:[#allocation8 + $0x518] sm:$0xf0]  ;;  %v2690_v46 = vld [vmem:[#allocation8 + $0x500] sm:$0xf]  ;;  %v2692_v49 = vld [vmem:[#allocation8 + $0x508] sm:$0xf0] }
 0x303   :  { %v2703_v45 = vor.u32 %v3050_v42, %v2700_v44 }
 0x304   :  { %1509 = vmatpush.bf16.msra.mxu2 %v2563_v55  ;;  %1806 = vmatpush.bf16.msra.mxu1 %v2815_v63  ;;  %v2730_v55 = vld [vmem:[#allocation8 + $0x550] sm:$0xf]  ;;  %v2780_v63 = vld [vmem:[#allocation8 + $0x5b8] sm:$0xf0] }
 0x305   :  { %1778 = vmatpush.bf16.msrb.mxu3 %v2811_v59  ;;  %v2731_v2 = vor.u32 %v3059_v56, %v2730_v55  ;;  %v2778_v59 = vld [vmem:[#allocation8 + $0x5b0] sm:$0xf]  ;;  %v2783_v1 = vor.u32 %v3070_v62, %v2780_v63 }
 0x306   :  { %1537 = vmatpush.bf16.msrb.mxu0 %v2567_v0  ;;  %v3058_v0 = vld [vmem:[#allocation8 + $0x554] sm:$0xf]  ;;  %v2779_v61 = vor.u32 %v3071_v60, %v2778_v59 }
 0x307   :  { %v2735_v58 = vor.u32 %v3058_v0, %v2732_v57 }
 0x308   :  { %1764 = vmatpush.bf16.msrb.mxu2 %v2747_v10  ;;  %1807 = vmatpush.bf16.msra.mxu1 %v2807_v9  ;;  %v2770_v9 = vld [vmem:[#allocation8 + $0x5a0] sm:$0xf]  ;;  %v3069_v10 = vld [vmem:[#allocation8 + $0x5a4] sm:$0xf0] }
 0x309   :  { %1779 = vmatpush.bf16.msrb.mxu3 %v2803_v5  ;;  %v3056_v5 = vld [vmem:[#allocation8 + $0x544] sm:$0xf]  ;;  %v2771_v12 = vor.u32 %v3069_v10, %v2770_v9 }
 0x30a   :  { %1792 = vmatpush.bf16.msra.mxu0 %v2751_v11  ;;  %v2727_v8 = vor.u32 %v3056_v5, %v2724_v7  ;;  %v3068_v11 = vld [vmem:[#allocation8 + $0x5a4] sm:$0xf] }
 0x30c   :  { %1808 = vmatpush.bf16.msra.mxu1 %v2799_v43  ;;  %1765 = vmatpush.bf16.msrb.mxu2 %v2739_v47  ;;  %v3049_v47 = vld [vmem:[#allocation8 + $0x504] sm:$0xf0] }
 0x30d   :  { %1780 = vmatpush.bf16.msrb.mxu3 %v2795_v41  ;;  %v3051_v41 = vld [vmem:[#allocation8 + $0x514] sm:$0xf0]  ;;  %v2691_v39 = vor.u32 %v3049_v47, %v2690_v46 }
 0x30e   :  { %1793 = vmatpush.bf16.msra.mxu0 %v2743_v50  ;;  %v2699_v43 = vor.u32 %v3051_v41, %v2698_v40  ;;  %v2695_v50 = vor.u32 %v3048_v48, %v2692_v49 }
 0x310   :  { %1809 = vmatpush.bf16.msra.mxu1 %v2791_v54  ;;  %1766 = vmatpush.bf16.msrb.mxu2 %v2731_v2  ;;  %v1336_v54 = vld [vmem:[#allocation10 + $0x8] sm:$0x3] }
 0x311   :  { %1781 = vmatpush.bf16.msrb.mxu3 %v2787_v51  ;;  %v3095_v51 = vld [vmem:[#allocation11 + $0x78] sm:$0xff]  ;;  %v1339_v0 = vperm.slane %v1336_v54, 1  ;;  %v1338_v59 = vperm.slane %v1336_v54, 0 }
 0x312   :  { %1794 = vmatpush.bf16.msra.mxu0 %v2735_v58 }
 0x314   :  { %1810 = vmatpush.bf16.msra.mxu1 %v2783_v1  ;;  %1767 = vmatpush.bf16.msrb.mxu2 %v2723_v6 }
 0x315   :  { %1782 = vmatpush.bf16.msrb.mxu3 %v2779_v61 }
 0x316   :  { %1795 = vmatpush.bf16.msra.mxu0 %v2727_v8 }
 0x319   :  { %1783 = vmatpush.bf16.msrb.mxu3 %v2771_v12 }
 0x376   :  { %v1291_v13 = vpop.f32.mrf.mxu1 }
 0x37c   :  { %v1277_v14 = vpop.f32.mrf.mxu0  ;;  %v1263_v17 = vpop.f32.mrf.mxu3 }
 0x37d   :  { %v1278_v16 = vadd.f32 %v1277_v14, %v1077_v15 }
 0x37e   :  { %v1293_v23 = vpop.f32.mrf.mxu1 }
 0x37f   :  { %v1292_v21 = vadd.f32 %v1291_v13, %v1278_v16  ;;  %v2772_v13 = vld [vmem:[#allocation8 + $0x5a8] sm:$0xf0]  ;;  %v3055_v16 = vld [vmem:[#allocation8 + $0x534] sm:$0xf0] }
 0x380   :  { %v2775_v14 = vor.u32 %v3068_v11, %v2772_v13 }
 0x381   :  { %v1297_v26 = vmax.f32 %v1292_v21, 0.0  ;;  %v2762_v21 = vld [vmem:[#allocation8 + $0x590] sm:$0xf] }
 0x382   :  { %v1249_v18 = vpop.f32.mrf.mxu2  ;;  %1811 = vmatpush.bf16.msra.mxu1 %v2775_v14 }
 0x383   :  { %v1250_v24 = vadd.f32 %v1249_v18, %v1076_v19 }
 0x384   :  { %v1279_v20 = vpop.f32.mrf.mxu0  ;;  %v1265_v32 = vpop.f32.mrf.mxu3 }
 0x385   :  { %v1280_v22 = vadd.f32 %v1279_v20, %v1077_v15  ;;  %v1264_v29 = vadd.f32 %v1263_v17, %v1250_v24  ;;  %v2714_v15 = vld [vmem:[#allocation8 + $0x530] sm:$0xf]  ;;  %v3054_v17 = vld [vmem:[#allocation8 + $0x534] sm:$0xf] }
 0x386   :  { %v2715_v18 = vor.u32 %v3055_v16, %v2714_v15  ;;  %v3093_v15 = vld [vmem:[#allocation11 + $0x68] sm:$0xff]  ;;  %v3086_v16 = vld [vmem:[#allocation11 + $0x30] sm:$0xff] }
 0x387   :  { %v1294_v25 = vadd.f32 %v1293_v23, %v1280_v22  ;;  %v1296_v34 = vmax.f32 %v1264_v29, 0.0  ;;  %v3067_v22 = vld [vmem:[#allocation8 + $0x594] sm:$0xf0]  ;;  %v3066_v23 = vld [vmem:[#allocation8 + $0x594] sm:$0xf] }
 0x388   :  { %1768 = vmatpush.bf16.msrb.mxu2 %v2715_v18  ;;  %v2763_v24 = vor.u32 %v3067_v22, %v2762_v21  ;;  %v3052_v29 = vld [vmem:[#allocation8 + $0x524] sm:$0xf]  ;;  %v3085_v18 = vld [vmem:[#allocation11 + $0x28] sm:$0xff]  ;;  %v3090_v21 = vld [vmem:[#allocation11 + $0x50] sm:$0xff] }
 0x389   :  { %v1299_v27 = vmax.f32 %v1294_v25, 0.0  ;;  %v2764_v25 = vld [vmem:[#allocation8 + $0x598] sm:$0xf0]  ;;  %v3083_v22 = vld [vmem:[#allocation11 + $0x18] sm:$0xff] }
 0x38a   :  { %v1251_v28 = vpop.f32.mrf.mxu2  ;;  %1784 = vmatpush.bf16.msrb.mxu3 %v2763_v24  ;;  %v3082_v24 = vld [vmem:[#allocation11 + $0x10] sm:$0xff] }
 0x38b   :  { %v1301_v30 = vpack.c.bf16 %v1299_v27, %v1297_v26  ;;  %v1252_v31 = vadd.f32 %v1251_v28, %v1076_v19  ;;  %v2716_v19 = vld [vmem:[#allocation8 + $0x538] sm:$0xf0]  ;;  %v2767_v26 = vor.u32 %v3066_v23, %v2764_v25  ;;  %v2706_v27 = vld [vmem:[#allocation8 + $0x520] sm:$0xf]  ;;  %v3053_v28 = vld [vmem:[#allocation8 + $0x524] sm:$0xf0] }
 0x38c   :  { %v2719_v20 = vor.u32 %v3054_v17, %v2716_v19  ;;  %v3092_v17 = vld [vmem:[#allocation11 + $0x60] sm:$0xff]  ;;  %v3091_v19 = vld [vmem:[#allocation11 + $0x58] sm:$0xff]  ;;  %v3089_v23 = vld [vmem:[#allocation11 + $0x48] sm:$0xff] }
 0x38d   :  { %v1266_v33 = vadd.f32 %v1265_v32, %v1252_v31  ;;  %1524 = vmatmul.bf16.vlgmr.msra.gmra.mxu3 %v1301_v30  ;;  %1552 = vmatmul.bf16.vlgmr.msrb.gmra.mxu1 %v1301_v30  ;;  %v2707_v30 = vor.u32 %v3053_v28, %v2706_v27  ;;  %v2708_v31 = vld [vmem:[#allocation8 + $0x528] sm:$0xf0]  ;;  %v1598_v28 = vld [vmem:[#allocation10 + $0xa] sm:$0x3] }
 0x38e   :  { %1796 = vmatpush.bf16.msra.mxu0 %v2719_v20  ;;  %1812 = vmatpush.bf16.msra.mxu1 %v2767_v26  ;;  %v2711_v32 = vor.u32 %v3052_v29, %v2708_v31  ;;  %v3084_v20 = vld [vmem:[#allocation11 + $0x20] sm:$0xff]  ;;  %v3081_v26 = vld [vmem:[#allocation11 + $0x8] sm:$0xff]  ;;  %v1601_v31 = vperm.slane %v1598_v28, 1 }
 0x38f   :  { %v1298_v35 = vmax.f32 %v1266_v33, 0.0  ;;  %v2754_v33 = vld [vmem:[#allocation8 + $0x580] sm:$0xf]  ;;  %1769 = vmatpush.bf16.msrb.mxu2 %v2707_v30  ;;  %v3088_v25 = vld [vmem:[#allocation11 + $0x40] sm:$0xff] }
 0x390   :  { %v3080_v27 = vld [vmem:[#allocation11] sm:$0xff] }
 0x391   :  { %v1300_v36 = vpack.c.bf16 %v1298_v35, %v1296_v34  ;;  %v3065_v34 = vld [vmem:[#allocation8 + $0x584] sm:$0xf0]  ;;  %v3064_v35 = vld [vmem:[#allocation8 + $0x584] sm:$0xf] }
 0x392   :  { %1797 = vmatpush.bf16.msra.mxu0 %v2711_v32  ;;  %v2759_v38 = vor.u32 %v3064_v35, %v2756_v37  ;;  %v1600_v35 = vperm.slane %v1598_v28, 0 }
 0x393   :  { %1510 = vmatmul.bf16.vlgmr.msra.gmra.mxu2 %v1300_v36  ;;  %1538 = vmatmul.bf16.vlgmr.msrb.gmra.mxu0 %v1300_v36  ;;  %v2755_v36 = vor.u32 %v3065_v34, %v2754_v33 }
 0x394   :  { %1813 = vmatpush.bf16.msra.mxu1 %v2759_v38  ;;  %1770 = vmatpush.bf16.msrb.mxu2 %v2699_v43 }
 0x395   :  { %1785 = vmatpush.bf16.msrb.mxu3 %v2755_v36 }
 0x396   :  { %1798 = vmatpush.bf16.msra.mxu0 %v2703_v45 }
 0x398   :  { %1771 = vmatpush.bf16.msrb.mxu2 %v2691_v39 }
 0x399   :  { %1972 = vmatpush.bf16.msra.mxu3 %v3095_v51 }
 0x39a   :  { %1799 = vmatpush.bf16.msra.mxu0 %v2695_v50 }
 0x39c   :  { %1958 = vmatpush.bf16.msra.mxu2 %v3087_v52 }
 0x39d   :  { %1973 = vmatpush.bf16.msra.mxu3 %v3094_v53 }
 0x3a0   :  { %1959 = vmatpush.bf16.msra.mxu2 %v3086_v16 }
 0x3a1   :  { %1974 = vmatpush.bf16.msra.mxu3 %v3093_v15 }
 0x3a4   :  { %1960 = vmatpush.bf16.msra.mxu2 %v3085_v18 }
 0x3a5   :  { %1975 = vmatpush.bf16.msra.mxu3 %v3092_v17 }
 0x3a8   :  { %1961 = vmatpush.bf16.msra.mxu2 %v3084_v20 }
 0x3a9   :  { %1976 = vmatpush.bf16.msra.mxu3 %v3091_v19 }
 0x3ac   :  { %1962 = vmatpush.bf16.msra.mxu2 %v3083_v22 }
 0x3ad   :  { %1977 = vmatpush.bf16.msra.mxu3 %v3090_v21 }
 0x3b0   :  { %1963 = vmatpush.bf16.msra.mxu2 %v3082_v24 }
 0x3b1   :  { %1978 = vmatpush.bf16.msra.mxu3 %v3089_v23 }
 0x3b4   :  { %1964 = vmatpush.bf16.msra.mxu2 %v3081_v26 }
 0x3b5   :  { %1979 = vmatpush.bf16.msra.mxu3 %v3088_v25 }
 0x3b8   :  { %1965 = vmatpush.bf16.msra.mxu2 %v3080_v27 }
 0x40a   :  { %v1553_v55 = vpop.f32.mrf.mxu1 }
 0x410   :  { %v1539_v56 = vpop.f32.mrf.mxu0  ;;  %v1525_v57 = vpop.f32.mrf.mxu3 }
 0x411   :  { %v1540_v2 = vadd.f32 %v1539_v56, %v1339_v0 }
 0x412   :  { %v1555_v63 = vpop.f32.mrf.mxu1 }
 0x413   :  { %v1554_v61 = vadd.f32 %v1553_v55, %v1540_v2  ;;  %v3115_v55 = vld [vmem:[%s3409_s6] ss:$0 sm:$0xff] }
 0x415   :  { %v1559_v4 = vmax.f32 %v1554_v61, 0.0 }
 0x416   :  { %v1511_v58 = vpop.f32.mrf.mxu2 }
 0x417   :  { %v1512_v1 = vadd.f32 %v1511_v58, %v1338_v59 }
 0x418   :  { %v1541_v60 = vpop.f32.mrf.mxu0  ;;  %v1527_v10 = vpop.f32.mrf.mxu3 }
 0x419   :  { %v1542_v62 = vadd.f32 %v1541_v60, %v1339_v0  ;;  %v1526_v7 = vadd.f32 %v1525_v57, %v1512_v1 }
 0x41b   :  { %v1556_v3 = vadd.f32 %v1555_v63, %v1542_v62  ;;  %v1558_v12 = vmax.f32 %v1526_v7, 0.0 }
 0x41d   :  { %v1561_v5 = vmax.f32 %v1556_v3, 0.0 }
 0x41e   :  { %v1513_v6 = vpop.f32.mrf.mxu2 }
 0x41f   :  { %v1563_v8 = vpack.c.bf16 %v1561_v5, %v1559_v4  ;;  %v1514_v9 = vadd.f32 %v1513_v6, %v1338_v59 }
 0x421   :  { %v1528_v11 = vadd.f32 %v1527_v10, %v1514_v9  ;;  %1786 = vmatmul.bf16.vlgmr.msrb.gmra.mxu3 %v1563_v8  ;;  %1814 = vmatmul.bf16.vlgmr.msra.gmra.mxu1 %v1563_v8 }
 0x423   :  { %v1560_v13 = vmax.f32 %v1528_v11, 0.0 }
 0x425   :  { %v1562_v14 = vpack.c.bf16 %v1560_v13, %v1558_v12 }
 0x427   :  { %1772 = vmatmul.bf16.vlgmr.msrb.gmra.mxu2 %v1562_v14  ;;  %1800 = vmatmul.bf16.vlgmr.msra.gmra.mxu0 %v1562_v14 }
 0x49e   :  { %v1815_v29 = vpop.f32.mrf.mxu1 }
 0x4a4   :  { %v1801_v30 = vpop.f32.mrf.mxu0  ;;  %v1787_v33 = vpop.f32.mrf.mxu3 }
 0x4a5   :  { %v1802_v32 = vadd.f32 %v1801_v30, %v1601_v31 }
 0x4a6   :  { %v1817_v40 = vpop.f32.mrf.mxu1 }
 0x4a7   :  { %v1816_v37 = vadd.f32 %v1815_v29, %v1802_v32 }
 0x4a9   :  { %v1821_v43 = vmax.f32 %v1816_v37, 0.0 }
 0x4aa   :  { %v1773_v34 = vpop.f32.mrf.mxu2 }
 0x4ab   :  { %v1774_v41 = vadd.f32 %v1773_v34, %v1600_v35 }
 0x4ac   :  { %v1803_v36 = vpop.f32.mrf.mxu0  ;;  %v1789_v39 = vpop.f32.mrf.mxu3 }
 0x4ad   :  { %v1804_v38 = vadd.f32 %v1803_v36, %v1601_v31  ;;  %v1788_v46 = vadd.f32 %v1787_v33, %v1774_v41 }
 0x4af   :  { %v1818_v42 = vadd.f32 %v1817_v40, %v1804_v38  ;;  %v1820_v50 = vmax.f32 %v1788_v46, 0.0 }
 0x4b1   :  { %v1823_v44 = vmax.f32 %v1818_v42, 0.0 }
 0x4b2   :  { %v1775_v45 = vpop.f32.mrf.mxu2 }
 0x4b3   :  { %v1825_v47 = vpack.c.bf16 %v1823_v44, %v1821_v43  ;;  %v1776_v48 = vadd.f32 %v1775_v45, %v1600_v35 }
 0x4b5   :  { %v1790_v49 = vadd.f32 %v1789_v39, %v1776_v48  ;;  %1980 = vmatmul.bf16.vlgmr.msra.gmra.mxu3 %v1825_v47 }
 0x4b7   :  { %v1822_v51 = vmax.f32 %v1790_v49, 0.0 }
 0x4b9   :  { %v1824_v52 = vpack.c.bf16 %v1822_v51, %v1820_v50 }
 0x4bb   :  { %1966 = vmatmul.bf16.vlgmr.msra.gmra.mxu2 %v1824_v52 }
 0x538   :  { %v1981_v53 = vpop.f32.mrf.mxu3 }
 0x53e   :  { %v1967_v54 = vpop.f32.mrf.mxu2 }
 0x53f   :  { %v1968_v56 = vadd.f32 %v3115_v55, %v1967_v54 }
 0x540   :  { %v1983_v58 = vpop.f32.mrf.mxu3 }
 0x541   :  { %v1982_v2 = vadd.f32 %v1981_v53, %v1968_v56 }
 0x543   :  { %v1986_v60 = vmax.f32 %v1982_v2, 0.0 }
 0x546   :  { %v1969_v0 = vpop.f32.mrf.mxu2 }
 0x547   :  { %v1970_v57 = vadd.f32 %v3115_v55, %v1969_v0 }
 0x549   :  { %v1984_v59 = vadd.f32 %v1983_v58, %v1970_v57 }
 0x54b   :  { %v1987_v61 = vmax.f32 %v1984_v59, 0.0 }
 0x54d   :  { %v3099_v62 = vpack.c.bf16 %v1987_v61, %v1986_v60 }
 0x54f   :  { %3100 = vst [vmem:[#allocation13] sm:$0xff] %v3099_v62  }
 0x550   :  { %2004 = dma.vmem_to_hbm [thread:$0]  %s1997_s11, 128, %s1999_s14, [#allocation4], %s3310_s8, %s3310_s8, %s3311_s9  }
 0x551   :  { %3298 = dma.done.wait [#allocation4], 128  }
 0x552   :  { %3299 = vsyncadd [#allocation4], 4294967168 }
 0x553   :  { %2009 = vsyncpa [#allocation3], 1 }
 0x554   :  { %2010 = vsyncpa [#allocation6], 1 }
 0x555   :  { %2011 = vsyncpa [#allocation9], 1 }
 0x556   :  { %2012 = vsyncpa [#allocation12], 1 }
 0x557   :  { %2013 = vsyncpa [#allocation4], 1 }

</bundles_post_ra>
